<compile_context>
chip_gen: v6e
topology: v6e:2x2x1
jax: 0.10.0
libtpu: 0.0.40
codegen_flags: <defaults>
</compile_context>

<pallas_src>
import functools
import math

import jax
import jax.numpy as jnp
import numpy as np
from jax.experimental import pallas as pl
from jax.experimental.pallas import tpu as pltpu

LN_EPS = 1e-12
VMEM_LIMIT = 64 * 1024 * 1024   # explicit scoped-VMEM limit for all kernels

# Tile-size targets (capped / shrunk to divisors of the actual dims below).
TM_TARGET = 256    # matmul rows
TN_TARGET = 512    # matmul output columns (lane-dense stores)
TK_TARGET = 512    # matmul contraction
TLN_TARGET = 1024  # layernorm rows
TQ_TARGET = 256    # attention query tile
TKV_TARGET = 512   # attention key/value tile


def _pick_tile(dim, target, align):
    """Largest tile <= target that divides `dim` and is a multiple of `align`.

    Falls back to the full dimension (always legal as a block shape)."""
    if dim <= target:
        return dim
    t = target
    while t >= align and dim % t != 0:
        t //= 2
    if t < align or dim % t != 0 or t % align != 0:
        return dim
    return t


# ---------------------------------------------------------------------------
# LayerNorm kernel (row-tiled, f32 statistics)
# ---------------------------------------------------------------------------
def _layernorm_kernel(x_ref, w_ref, b_ref, o_ref):
    x = x_ref[...].astype(jnp.float32)
    u = jnp.mean(x, axis=-1, keepdims=True)
    d = x - u
    s = jnp.mean(d * d, axis=-1, keepdims=True)
    y = d * jax.lax.rsqrt(s + LN_EPS)
    o_ref[...] = (w_ref[...].astype(jnp.float32) * y
                  + b_ref[...].astype(jnp.float32)).astype(o_ref.dtype)


def layernorm(x2d, w, b, out_dtype=None):
    M, H = x2d.shape
    out_dtype = out_dtype or x2d.dtype
    tm = _pick_tile(M, TLN_TARGET, 8)
    return pl.pallas_call(
        _layernorm_kernel,
        out_shape=jax.ShapeDtypeStruct((M, H), out_dtype),
        grid=(M // tm,),
        in_specs=[
            pl.BlockSpec((tm, H), lambda i: (i, 0)),
            pl.BlockSpec((1, H), lambda i: (0, 0)),
            pl.BlockSpec((1, H), lambda i: (0, 0)),
        ],
        out_specs=pl.BlockSpec((tm, H), lambda i: (i, 0)),
        compiler_params=pltpu.CompilerParams(
            dimension_semantics=("parallel",),
            vmem_limit_bytes=VMEM_LIMIT),
    )(x2d, w.reshape(1, H), b.reshape(1, H))


# ---------------------------------------------------------------------------
# Linear (matmul) kernel: tiled, f32 accumulator, fused bias/GELU/residual
# ---------------------------------------------------------------------------
def _erf_approx(x):
    # Abramowitz & Stegun 7.1.26 rational approximation (|err| < 1.5e-7).
    a1, a2, a3, a4, a5 = (0.254829592, -0.284496736, 1.421413741,
                          -1.453152027, 1.061405429)
    p = 0.3275911
    s = jnp.where(x >= 0.0, 1.0, -1.0)
    ax = jnp.abs(x)
    t = 1.0 / (1.0 + p * ax)
    poly = ((((a5 * t + a4) * t + a3) * t + a2) * t + a1) * t
    return s * (1.0 - poly * jnp.exp(-ax * ax))


def _make_linear_kernel(apply_gelu, has_residual):
    def kernel(*refs):
        if has_residual:
            x_ref, w_ref, b_ref, r_ref, o_ref, acc_ref = refs
        else:
            x_ref, w_ref, b_ref, o_ref, acc_ref = refs
            r_ref = None
        k = pl.program_id(2)

        @pl.when(k == 0)
        def _():
            acc_ref[...] = jnp.zeros_like(acc_ref)

        acc_ref[...] += jnp.dot(x_ref[...], w_ref[...],
                                preferred_element_type=jnp.float32)

        @pl.when(k == pl.num_programs(2) - 1)
        def _():
            y = acc_ref[...] + b_ref[...].astype(jnp.float32)
            if apply_gelu:
                # exact (erf-based) GELU, matching F.gelu default
                y = 0.5 * y * (1.0 + _erf_approx(y * (1.0 / math.sqrt(2.0))))
            if has_residual:
                y = y + r_ref[...].astype(jnp.float32)
            o_ref[...] = y.astype(o_ref.dtype)

    return kernel


def linear(x2d, w_io, b, residual=None, apply_gelu=False, out_dtype=None):
    """y = x @ W + b  (W stored [in, out]); optional fused GELU / residual."""
    M, K = x2d.shape
    K2, N = w_io.shape
    assert K == K2
    out_dtype = out_dtype or x2d.dtype

    tm = _pick_tile(M, TM_TARGET, 8)
    tn = _pick_tile(N, TN_TARGET, 128)
    tk = _pick_tile(K, TK_TARGET, 128)
    grid = (M // tm, N // tn, K // tk)

    in_specs = [
        pl.BlockSpec((tm, tk), lambda i, j, k: (i, k)),
        pl.BlockSpec((tk, tn), lambda i, j, k: (k, j)),
        pl.BlockSpec((1, tn), lambda i, j, k: (0, j)),
    ]
    args = [x2d, w_io, b.reshape(1, N)]
    if residual is not None:
        in_specs.append(pl.BlockSpec((tm, tn), lambda i, j, k: (i, j)))
        args.append(residual)

    return pl.pallas_call(
        _make_linear_kernel(apply_gelu, residual is not None),
        out_shape=jax.ShapeDtypeStruct((M, N), out_dtype),
        grid=grid,
        in_specs=in_specs,
        out_specs=pl.BlockSpec((tm, tn), lambda i, j, k: (i, j)),
        scratch_shapes=[pltpu.VMEM((tm, tn), jnp.float32)],
        compiler_params=pltpu.CompilerParams(
            dimension_semantics=("parallel", "parallel", "arbitrary"),
            vmem_limit_bytes=VMEM_LIMIT),
    )(*args)


# ---------------------------------------------------------------------------
# Attention kernel: flash-style online softmax, tiled (b, h, q-tile, kv-tile)
# ---------------------------------------------------------------------------
def _attention_kernel(q_ref, k_ref, v_ref, m_ref, o_ref,
                      m_sc, l_sc, acc_sc, *, scale):
    ki = pl.program_id(3)

    @pl.when(ki == 0)
    def _():
        m_sc[...] = jnp.full_like(m_sc, -jnp.inf)
        l_sc[...] = jnp.zeros_like(l_sc)
        acc_sc[...] = jnp.zeros_like(acc_sc)

    q = q_ref[0, 0]                    # [tq, Dh]   bf16
    k = k_ref[0, 0]                    # [tkv, Dh]  bf16
    v = v_ref[0, 0]                    # [tkv, Dh]  bf16

    # scores = (q @ k.T) * scale, masked_fill(mask == 0, -1e9)   (f32)
    s = jax.lax.dot_general(q, k, (((1,), (1,)), ((), ())),
                            preferred_element_type=jnp.float32) * scale
    key_ok = m_ref[0] > 0.0            # [1, tkv]
    s = jnp.where(key_ok, s, -1e9)

    m_prev = m_sc[...]
    m_new = jnp.maximum(m_prev, jnp.max(s, axis=-1, keepdims=True))
    alpha = jnp.exp(m_prev - m_new)
    p = jnp.exp(s - m_new)
    l_sc[...] = alpha * l_sc[...] + jnp.sum(p, axis=-1, keepdims=True)
    acc_sc[...] = alpha * acc_sc[...] + jnp.dot(
        p.astype(v.dtype), v, preferred_element_type=jnp.float32)
    m_sc[...] = m_new

    @pl.when(ki == pl.num_programs(3) - 1)
    def _():
        inv = pl.reciprocal(l_sc[...], approx=True)
        o_ref[0, 0] = (acc_sc[...] * inv).astype(o_ref.dtype)


def attention(q, k, v, key_valid):
    """q, k, v: [B, nH, S, Dh]; key_valid: [B, 1, S] float (1 keep, 0 mask)."""
    B, nH, S, Dh = q.shape
    tq = _pick_tile(S, TQ_TARGET, 8)
    tkv = _pick_tile(S, TKV_TARGET, 128)
    grid = (B, nH, S // tq, S // tkv)

    kernel = functools.partial(_attention_kernel, scale=1.0 / math.sqrt(Dh))
    q_spec = pl.BlockSpec((1, 1, tq, Dh), lambda b, h, qi, ki: (b, h, qi, 0))
    kv_spec = pl.BlockSpec((1, 1, tkv, Dh), lambda b, h, qi, ki: (b, h, ki, 0))

    return pl.pallas_call(
        kernel,
        out_shape=jax.ShapeDtypeStruct((B, nH, S, Dh), q.dtype),
        grid=grid,
        in_specs=[q_spec, kv_spec, kv_spec,
                  pl.BlockSpec((1, 1, tkv), lambda b, h, qi, ki: (b, 0, ki))],
        out_specs=q_spec,
        scratch_shapes=[pltpu.VMEM((tq, 1), jnp.float32),
                        pltpu.VMEM((tq, 1), jnp.float32),
                        pltpu.VMEM((tq, Dh), jnp.float32)],
        compiler_params=pltpu.CompilerParams(
            dimension_semantics=("parallel", "parallel", "parallel",
                                 "arbitrary"),
            vmem_limit_bytes=VMEM_LIMIT),
    )(q, k, v, key_valid)


# ---------------------------------------------------------------------------
# Parameter initialization (weights pre-transposed [in, out], QKV fused,
# matmul weights in bf16, LN params / biases in f32)
# ---------------------------------------------------------------------------
def init_params(key, cfg, wdtype=jnp.bfloat16):
    H = cfg["hidden_size"]
    I = cfg["intermediate_size"]
    V = cfg["vocab_size"]
    std = cfg["initializer_range"]

    def normal(k, shape):
        return (std * jax.random.normal(k, shape, dtype=jnp.float32)).astype(wdtype)

    n_l = cfg["num_hidden_layers"]
    keys = jax.random.split(key, 2 + 4 * n_l)
    params = {
        "word_emb": normal(keys[0], (V, H)),
        "tok_emb": normal(keys[1], (2, H)),
        "emb_ln_w": jnp.ones((H,), jnp.float32),
        "emb_ln_b": jnp.zeros((H,), jnp.float32),
        "layers": [],
    }
    for l in range(n_l):
        ks = keys[2 + 4 * l: 2 + 4 * (l + 1)]
        params["layers"].append({
            "w_qkv": normal(ks[0], (H, 3 * H)),
            "b_qkv": jnp.zeros((3 * H,), jnp.float32),
            "wo": normal(ks[1], (H, H)), "bo": jnp.zeros((H,), jnp.float32),
            "ln1_w": jnp.ones((H,), jnp.float32),
            "ln1_b": jnp.zeros((H,), jnp.float32),
            "w1": normal(ks[2], (H, I)), "b1": jnp.zeros((I,), jnp.float32),
            "w2": normal(ks[3], (I, H)), "b2": jnp.zeros((H,), jnp.float32),
            "ln2_w": jnp.ones((H,), jnp.float32),
            "ln2_b": jnp.zeros((H,), jnp.float32),
        })
    return params


# ---------------------------------------------------------------------------
# BERT forward (Pallas kernels on the hot path; gathers/reshapes are glue)
# ---------------------------------------------------------------------------
def bert_forward(params, cfg, input_ids, token_type_ids=None):
    B, S = input_ids.shape
    H = cfg["hidden_size"]
    nH = cfg["num_attention_heads"]
    Dh = H // nH

    if token_type_ids is None:
        token_type_ids = jnp.zeros_like(input_ids)

    # mask = (x > 1) along the key axis (broadcast over heads & queries)
    key_valid = (input_ids > 1).astype(jnp.float32).reshape(B, 1, S)

    # embeddings (gather is glue; LayerNorm is a kernel)
    emb = (jnp.take(params["word_emb"], input_ids, axis=0)
           + jnp.take(params["tok_emb"], token_type_ids, axis=0))
    x = layernorm(emb.reshape(B * S, H), params["emb_ln_w"], params["emb_ln_b"])
    # TODO(synk): dropout layers are identity here (inference / eval mode).

    for lp in params["layers"]:
        # --- attention sublayer: x = x + Wo(Attn(LN(x))) ---
        xn = layernorm(x, lp["ln1_w"], lp["ln1_b"])
        qkv = linear(xn, lp["w_qkv"], lp["b_qkv"])                   # [M, 3H]
        qkv = qkv.reshape(B, S, 3, nH, Dh).transpose(2, 0, 3, 1, 4)  # [3,B,nH,S,Dh]
        a = attention(qkv[0], qkv[1], qkv[2], key_valid)             # [B,nH,S,Dh]
        a2d = a.transpose(0, 2, 1, 3).reshape(B * S, H)              # b h t d -> b t (h d)
        x = linear(a2d, lp["wo"], lp["bo"], residual=x)              # fused residual

        # --- feed-forward sublayer: x = x + W2(gelu(W1(LN(x)))) ---
        xn = layernorm(x, lp["ln2_w"], lp["ln2_b"])
        h = linear(xn, lp["w1"], lp["b1"], apply_gelu=True)
        x = linear(h, lp["w2"], lp["b2"], residual=x)                # fused residual

    x3 = x.reshape(B, S, H)
    return x3, x3[:, 0]


# ---------------------------------------------------------------------------
# Pure-JAX reference (f32 compute on the same parameters)
# ---------------------------------------------------------------------------
def _ref_ln(x, w, b):
    u = x.mean(-1, keepdims=True)
    s = ((x - u) ** 2).mean(-1, keepdims=True)
    return w * ((x - u) / jnp.sqrt(s + LN_EPS)) + b


def ref_forward(params, cfg, input_ids, token_type_ids=None):
    f32 = lambda t: t.astype(jnp.float32)
    B, S = input_ids.shape
    H = cfg["hidden_size"]
    nH = cfg["num_attention_heads"]
    Dh = H // nH
    if token_type_ids is None:
        token_type_ids = jnp.zeros_like(input_ids)
    key_ok = (input_ids > 1)[:, None, None, :]  # [B,1,1,S]

    emb = f32(params["word_emb"])[input_ids] + f32(params["tok_emb"])[token_type_ids]
    x = _ref_ln(emb, params["emb_ln_w"], params["emb_ln_b"])

    for lp in params["layers"]:
        xn = _ref_ln(x, lp["ln1_w"], lp["ln1_b"])
        qkv = xn @ f32(lp["w_qkv"]) + lp["b_qkv"]                    # [B,S,3H]
        qkv = qkv.reshape(B, S, 3, nH, Dh)
        q = qkv[:, :, 0].transpose(0, 2, 1, 3)
        k = qkv[:, :, 1].transpose(0, 2, 1, 3)
        v = qkv[:, :, 2].transpose(0, 2, 1, 3)
        scores = jnp.einsum("bhqd,bhkd->bhqk", q, k) / math.sqrt(Dh)
        scores = jnp.where(key_ok, scores, -1e9)
        p = jax.nn.softmax(scores, axis=-1)
        a = jnp.einsum("bhqk,bhkd->bhqd", p, v)
        a = a.transpose(0, 2, 1, 3).reshape(B, S, H)
        x = x + (a @ f32(lp["wo"]) + lp["bo"])

        xn = _ref_ln(x, lp["ln2_w"], lp["ln2_b"])
        h = jax.nn.gelu(xn @ f32(lp["w1"]) + lp["b1"], approximate=False)
        x = x + (h @ f32(lp["w2"]) + lp["b2"])
    return x, x[:, 0]


# ---------------------------------------------------------------------------
if __name__ == "__main__":
    cfg = dict(
        vocab_size=30,
        hidden_size=32,
        num_attention_heads=4,
        intermediate_size=64,
        num_hidden_layers=2,
        initializer_range=0.02,
    )
    B, S = 2, 8

    root = jax.random.PRNGKey(0)
    k_param, k_ids, k_tok = jax.random.split(root, 3)
    params = init_params(k_param, cfg)
    input_ids = jax.random.randint(k_ids, (B, S), 0, cfg["vocab_size"], dtype=jnp.int32)
    token_type_ids = jax.random.randint(k_tok, (B, S), 0, 2, dtype=jnp.int32)

    fwd = jax.jit(lambda p, ids, tt: bert_forward(p, cfg, ids, tt))
    seq_out, cls_out = fwd(params, input_ids, token_type_ids)
    jax.block_until_ready((seq_out, cls_out))

    ref_seq, ref_cls = ref_forward(params, cfg, input_ids, token_type_ids)
    np.testing.assert_allclose(np.asarray(seq_out.astype(jnp.float32)),
                               np.asarray(ref_seq), rtol=5e-2, atol=5e-2)
    np.testing.assert_allclose(np.asarray(cls_out.astype(jnp.float32)),
                               np.asarray(ref_cls), rtol=5e-2, atol=5e-2)

    print("KERNEL_OK")
</pallas_src>

<mosaic_0001>
module attributes {stable_mosaic.version = 11 : i64} {
  func.func @kernel(%arg0: i32, %arg1: i32, %arg2: i32, %arg3: memref<16x32xbf16, #tpu.memory_space<vmem>>, %arg4: memref<32x96xbf16, #tpu.memory_space<vmem>>, %arg5: memref<1x96xf32, #tpu.memory_space<vmem>>, %arg6: memref<16x96xbf16, #tpu.memory_space<vmem>>, %arg7: memref<16x96xf32, #tpu.memory_space<vmem>>) attributes {dimension_semantics = [#tpu.dimension_semantics<parallel>, #tpu.dimension_semantics<parallel>, #tpu.dimension_semantics<arbitrary>], iteration_bounds = array<i64: 1, 1, 1>, scalar_prefetch = 0 : i64, scratch_operands = 1 : i64, tpu.core_type = #tpu.core_type<tc>, window_params = [{transform_indices = @transform_0, window_bounds = array<i64: 16, 32>}, {transform_indices = @transform_1, window_bounds = array<i64: 32, 96>}, {transform_indices = @transform_2, window_bounds = array<i64: 1, 96>}, {transform_indices = @transform_3, window_bounds = array<i64: 16, 96>}]} {
    %c0_i32 = arith.constant 0 : i32
    %0 = arith.cmpi eq, %arg2, %c0_i32 : i32
    %1 = arith.extui %0 : i1 to i32
    %c0_i32_0 = arith.constant 0 : i32
    %2 = arith.cmpi ne, %1, %c0_i32_0 : i32
    scf.if %2 {
      %cst_10 = arith.constant 0.000000e+00 : f32
      %12 = vector.broadcast %cst_10 : f32 to vector<16x96xf32>
      %c0_11 = arith.constant 0 : index
      %c0_12 = arith.constant 0 : index
      %13 = vector.load %arg7[%c0_11, %c0_12] : memref<16x96xf32, #tpu.memory_space<vmem>>, vector<16x96xf32>
      tpu.vector_store %arg7[%c0_11, %c0_12], %12 {strides = array<i32>} : memref<16x96xf32, #tpu.memory_space<vmem>>, vector<16x96xf32>,
    } else {
    }
    %c0 = arith.constant 0 : index
    %c0_1 = arith.constant 0 : index
    %3 = vector.load %arg7[%c0, %c0_1] : memref<16x96xf32, #tpu.memory_space<vmem>>, vector<16x96xf32>
    %c0_2 = arith.constant 0 : index
    %c0_3 = arith.constant 0 : index
    %4 = vector.load %arg3[%c0_2, %c0_3] : memref<16x32xbf16, #tpu.memory_space<vmem>>, vector<16x32xbf16>
    %c0_4 = arith.constant 0 : index
    %c0_5 = arith.constant 0 : index
    %5 = vector.load %arg4[%c0_4, %c0_5] : memref<32x96xbf16, #tpu.memory_space<vmem>>, vector<32x96xbf16>
    %cst = arith.constant dense<0.000000e+00> : vector<16x96xf32>
    %6 = tpu.matmul %4, %5, %cst {dimension_numbers = #tpu.dot_dimension_numbers<[1], [0], [0], [1], [0, 0, 1, 1], [], []>} : vector<16x32xbf16>, vector<32x96xbf16>, vector<16x96xf32> -> vector<16x96xf32>
    %7 = arith.addf %3, %6 : vector<16x96xf32>
    %c0_6 = arith.constant 0 : index
    %c0_7 = arith.constant 0 : index
    %8 = vector.load %arg7[%c0_6, %c0_7] : memref<16x96xf32, #tpu.memory_space<vmem>>, vector<16x96xf32>
    tpu.vector_store %arg7[%c0_6, %c0_7], %7 {strides = array<i32>} : memref<16x96xf32, #tpu.memory_space<vmem>>, vector<16x96xf32>,
    %c0_i32_8 = arith.constant 0 : i32
    %9 = arith.cmpi eq, %arg2, %c0_i32_8 : i32
    %10 = arith.extui %9 : i1 to i32
    %c0_i32_9 = arith.constant 0 : i32
    %11 = arith.cmpi ne, %10, %c0_i32_9 : i32
    scf.if %11 {
      %c0_10 = arith.constant 0 : index
      %c0_11 = arith.constant 0 : index
      %12 = vector.load %arg7[%c0_10, %c0_11] : memref<16x96xf32, #tpu.memory_space<vmem>>, vector<16x96xf32>
      %c0_12 = arith.constant 0 : index
      %c0_13 = arith.constant 0 : index
      %13 = vector.load %arg5[%c0_12, %c0_13] : memref<1x96xf32, #tpu.memory_space<vmem>>, vector<1x96xf32>
      %14 = vector.broadcast %13 : vector<1x96xf32> to vector<16x96xf32>
      %15 = arith.addf %12, %14 : vector<16x96xf32>
      %16 = arith.truncf %15 : vector<16x96xf32> to vector<16x96xbf16>
      %c0_14 = arith.constant 0 : index
      %c0_15 = arith.constant 0 : index
      %17 = vector.load %arg6[%c0_14, %c0_15] : memref<16x96xbf16, #tpu.memory_space<vmem>>, vector<16x96xbf16>
      tpu.vector_store %arg6[%c0_14, %c0_15], %16 {strides = array<i32>} : memref<16x96xbf16, #tpu.memory_space<vmem>>, vector<16x96xbf16>,
    } else {
    }
    return
  }
  func.func @transform_0(%arg0: i32, %arg1: i32, %arg2: i32) -> (i32, i32) {
    %c0_i32 = arith.constant 0 : i32
    return %arg0, %arg2 : i32, i32
  }
  func.func @transform_1(%arg0: i32, %arg1: i32, %arg2: i32) -> (i32, i32) {
    %c0_i32 = arith.constant 0 : i32
    return %arg2, %arg1 : i32, i32
  }
  func.func @transform_2(%arg0: i32, %arg1: i32, %arg2: i32) -> (i32, i32) {
    %c0_i32 = arith.constant 0 : i32
    %c0_i32_0 = arith.constant 0 : i32
    return %c0_i32, %arg1 : i32, i32
  }
  func.func @transform_3(%arg0: i32, %arg1: i32, %arg2: i32) -> (i32, i32) {
    %c0_i32 = arith.constant 0 : i32
    return %arg0, %arg1 : i32, i32
  }
}

module attributes {stable_mosaic.version = 11 : i64} {
  func.func @_layernorm_kernel(%arg0: i32, %arg1: memref<16x32xbf16, #tpu.memory_space<vmem>>, %arg2: memref<1x32xf32, #tpu.memory_space<vmem>>, %arg3: memref<1x32xf32, #tpu.memory_space<vmem>>, %arg4: memref<16x32xbf16, #tpu.memory_space<vmem>>) attributes {dimension_semantics = [#tpu.dimension_semantics<parallel>], iteration_bounds = array<i64: 1>, scalar_prefetch = 0 : i64, scratch_operands = 0 : i64, tpu.core_type = #tpu.core_type<tc>, window_params = [{transform_indices = @transform_0, window_bounds = array<i64: 16, 32>}, {pipeline_mode = #tpu.pipeline_mode<synchronous>, transform_indices = @transform_1, window_bounds = array<i64: 1, 32>}, {pipeline_mode = #tpu.pipeline_mode<synchronous>, transform_indices = @transform_2, window_bounds = array<i64: 1, 32>}, {transform_indices = @transform_3, window_bounds = array<i64: 16, 32>}]} {
    %c0 = arith.constant 0 : index
    %c0_0 = arith.constant 0 : index
    %0 = vector.load %arg1[%c0, %c0_0] : memref<16x32xbf16, #tpu.memory_space<vmem>>, vector<16x32xbf16>
    %1 = arith.extf %0 : vector<16x32xbf16> to vector<16x32xf32>
    %cst = arith.constant dense<0.000000e+00> : vector<16xf32>
    %2 = vector.multi_reduction <add>, %1, %cst [1] : vector<16x32xf32> to vector<16xf32>
    %3 = vector.shape_cast %2 : vector<16xf32> to vector<16x1xf32>
    %cst_1 = arith.constant 3.200000e+01 : f32
    %4 = vector.broadcast %cst_1 : f32 to vector<16x1xf32>
    %5 = arith.divf %3, %4 : vector<16x1xf32>
    %6 = vector.broadcast %5 : vector<16x1xf32> to vector<16x32xf32>
    %7 = arith.subf %1, %6 : vector<16x32xf32>
    %8 = arith.mulf %7, %7 : vector<16x32xf32>
    %cst_2 = arith.constant dense<0.000000e+00> : vector<16xf32>
    %9 = vector.multi_reduction <add>, %8, %cst_2 [1] : vector<16x32xf32> to vector<16xf32>
    %10 = vector.shape_cast %9 : vector<16xf32> to vector<16x1xf32>
    %cst_3 = arith.constant 3.200000e+01 : f32
    %11 = vector.broadcast %cst_3 : f32 to vector<16x1xf32>
    %12 = arith.divf %10, %11 : vector<16x1xf32>
    %cst_4 = arith.constant 9.99999996E-13 : f32
    %13 = vector.broadcast %cst_4 : f32 to vector<16x1xf32>
    %14 = arith.addf %12, %13 : vector<16x1xf32>
    %15 = math.rsqrt %14 : vector<16x1xf32>
    %16 = vector.broadcast %15 : vector<16x1xf32> to vector<16x32xf32>
    %17 = arith.mulf %7, %16 : vector<16x32xf32>
    %c0_5 = arith.constant 0 : index
    %c0_6 = arith.constant 0 : index
    %18 = vector.load %arg2[%c0_5, %c0_6] : memref<1x32xf32, #tpu.memory_space<vmem>>, vector<1x32xf32>
    %19 = vector.broadcast %18 : vector<1x32xf32> to vector<16x32xf32>
    %20 = arith.mulf %19, %17 : vector<16x32xf32>
    %c0_7 = arith.constant 0 : index
    %c0_8 = arith.constant 0 : index
    %21 = vector.load %arg3[%c0_7, %c0_8] : memref<1x32xf32, #tpu.memory_space<vmem>>, vector<1x32xf32>
    %22 = vector.broadcast %21 : vector<1x32xf32> to vector<16x32xf32>
    %23 = arith.addf %20, %22 : vector<16x32xf32>
    %24 = arith.truncf %23 : vector<16x32xf32> to vector<16x32xbf16>
    %c0_9 = arith.constant 0 : index
    %c0_10 = arith.constant 0 : index
    %25 = vector.load %arg4[%c0_9, %c0_10] : memref<16x32xbf16, #tpu.memory_space<vmem>>, vector<16x32xbf16>
    tpu.vector_store %arg4[%c0_9, %c0_10], %24 {strides = array<i32>} : memref<16x32xbf16, #tpu.memory_space<vmem>>, vector<16x32xbf16>,
    return
  }
  func.func @transform_0(%arg0: i32) -> (i32, i32) {
    %c0_i32 = arith.constant 0 : i32
    %c0_i32_0 = arith.constant 0 : i32
    return %arg0, %c0_i32 : i32, i32
  }
  func.func @transform_1(%arg0: i32) -> (i32, i32) {
    %c0_i32 = arith.constant 0 : i32
    %c0_i32_0 = arith.constant 0 : i32
    %c0_i32_1 = arith.constant 0 : i32
    return %c0_i32, %c0_i32_0 : i32, i32
  }
  func.func @transform_2(%arg0: i32) -> (i32, i32) {
    %c0_i32 = arith.constant 0 : i32
    %c0_i32_0 = arith.constant 0 : i32
    %c0_i32_1 = arith.constant 0 : i32
    return %c0_i32, %c0_i32_0 : i32, i32
  }
  func.func @transform_3(%arg0: i32) -> (i32, i32) {
    %c0_i32 = arith.constant 0 : i32
    %c0_i32_0 = arith.constant 0 : i32
    return %arg0, %c0_i32 : i32, i32
  }
}

module attributes {stable_mosaic.version = 11 : i64} {
  func.func @_attention_kernel(%arg0: i32, %arg1: i32, %arg2: i32, %arg3: i32, %arg4: memref<1x1x8x8xbf16, #tpu.memory_space<vmem>>, %arg5: memref<1x1x8x8xbf16, #tpu.memory_space<vmem>>, %arg6: memref<1x1x8x8xbf16, #tpu.memory_space<vmem>>, %arg7: memref<1x1x8xf32, #tpu.memory_space<vmem>>, %arg8: memref<1x1x8x8xbf16, #tpu.memory_space<vmem>>, %arg9: memref<8x1xf32, #tpu.memory_space<vmem>>, %arg10: memref<8x1xf32, #tpu.memory_space<vmem>>, %arg11: memref<8x8xf32, #tpu.memory_space<vmem>>) attributes {dimension_semantics = [#tpu.dimension_semantics<parallel>, #tpu.dimension_semantics<parallel>, #tpu.dimension_semantics<parallel>, #tpu.dimension_semantics<arbitrary>], iteration_bounds = array<i64: 2, 4, 1, 1>, scalar_prefetch = 0 : i64, scratch_operands = 3 : i64, tpu.core_type = #tpu.core_type<tc>, window_params = [{transform_indices = @transform_0, window_bounds = array<i64: 1, 1, 8, 8>}, {transform_indices = @transform_1, window_bounds = array<i64: 1, 1, 8, 8>}, {transform_indices = @transform_2, window_bounds = array<i64: 1, 1, 8, 8>}, {transform_indices = @transform_3, window_bounds = array<i64: 1, 1, 8>}, {transform_indices = @transform_4, window_bounds = array<i64: 1, 1, 8, 8>}]} {
    %c0_i32 = arith.constant 0 : i32
    %0 = arith.cmpi eq, %arg3, %c0_i32 : i32
    %1 = arith.extui %0 : i1 to i32
    %c0_i32_0 = arith.constant 0 : i32
    %2 = arith.cmpi ne, %1, %c0_i32_0 : i32
    scf.if %2 {
      %cst_35 = arith.constant 0xFF800000 : f32
      %46 = vector.broadcast %cst_35 : f32 to vector<8x1xf32>
      %c0_36 = arith.constant 0 : index
      %c0_37 = arith.constant 0 : index
      %47 = vector.load %arg9[%c0_36, %c0_37] : memref<8x1xf32, #tpu.memory_space<vmem>>, vector<8x1xf32>
      tpu.vector_store %arg9[%c0_36, %c0_37], %46 {strides = array<i32>} : memref<8x1xf32, #tpu.memory_space<vmem>>, vector<8x1xf32>,
      %cst_38 = arith.constant 0.000000e+00 : f32
      %48 = vector.broadcast %cst_38 : f32 to vector<8x1xf32>
      %c0_39 = arith.constant 0 : index
      %c0_40 = arith.constant 0 : index
      %49 = vector.load %arg10[%c0_39, %c0_40] : memref<8x1xf32, #tpu.memory_space<vmem>>, vector<8x1xf32>
      tpu.vector_store %arg10[%c0_39, %c0_40], %48 {strides = array<i32>} : memref<8x1xf32, #tpu.memory_space<vmem>>, vector<8x1xf32>,
      %cst_41 = arith.constant 0.000000e+00 : f32
      %50 = vector.broadcast %cst_41 : f32 to vector<8x8xf32>
      %c0_42 = arith.constant 0 : index
      %c0_43 = arith.constant 0 : index
      %51 = vector.load %arg11[%c0_42, %c0_43] : memref<8x8xf32, #tpu.memory_space<vmem>>, vector<8x8xf32>
      tpu.vector_store %arg11[%c0_42, %c0_43], %50 {strides = array<i32>} : memref<8x8xf32, #tpu.memory_space<vmem>>, vector<8x8xf32>,
    } else {
    }
    %c0 = arith.constant 0 : index
    %c0_1 = arith.constant 0 : index
    %c0_2 = arith.constant 0 : index
    %c0_3 = arith.constant 0 : index
    %3 = vector.load %arg4[%c0, %c0_1, %c0_2, %c0_3] : memref<1x1x8x8xbf16, #tpu.memory_space<vmem>>, vector<1x1x8x8xbf16>
    %4 = vector.shape_cast %3 : vector<1x1x8x8xbf16> to vector<8x8xbf16>
    %c0_4 = arith.constant 0 : index
    %c0_5 = arith.constant 0 : index
    %c0_6 = arith.constant 0 : index
    %c0_7 = arith.constant 0 : index
    %5 = vector.load %arg5[%c0_4, %c0_5, %c0_6, %c0_7] : memref<1x1x8x8xbf16, #tpu.memory_space<vmem>>, vector<1x1x8x8xbf16>
    %6 = vector.shape_cast %5 : vector<1x1x8x8xbf16> to vector<8x8xbf16>
    %c0_8 = arith.constant 0 : index
    %c0_9 = arith.constant 0 : index
    %c0_10 = arith.constant 0 : index
    %c0_11 = arith.constant 0 : index
    %7 = vector.load %arg6[%c0_8, %c0_9, %c0_10, %c0_11] : memref<1x1x8x8xbf16, #tpu.memory_space<vmem>>, vector<1x1x8x8xbf16>
    %8 = vector.shape_cast %7 : vector<1x1x8x8xbf16> to vector<8x8xbf16>
    %cst = arith.constant dense<0.000000e+00> : vector<8x8xf32>
    %9 = tpu.matmul %4, %6, %cst {dimension_numbers = #tpu.dot_dimension_numbers<[1], [1], [0], [0], [0, 0, 1, 0], [], []>} : vector<8x8xbf16>, vector<8x8xbf16>, vector<8x8xf32> -> vector<8x8xf32>
    %cst_12 = arith.constant 0.353553385 : f32
    %10 = vector.broadcast %cst_12 : f32 to vector<8x8xf32>
    %11 = arith.mulf %9, %10 : vector<8x8xf32>
    %c0_13 = arith.constant 0 : index
    %c0_14 = arith.constant 0 : index
    %c0_15 = arith.constant 0 : index
    %12 = vector.load %arg7[%c0_13, %c0_14, %c0_15] : memref<1x1x8xf32, #tpu.memory_space<vmem>>, vector<1x1x8xf32>
    %13 = vector.shape_cast %12 : vector<1x1x8xf32> to vector<1x8xf32>
    %cst_16 = arith.constant 0.000000e+00 : f32
    %14 = vector.broadcast %cst_16 : f32 to vector<1x8xf32>
    %15 = arith.cmpf ogt, %13, %14 : vector<1x8xf32>
    %cst_17 = arith.constant -1.000000e+09 : f32
    %16 = vector.shape_cast %15 : vector<1x8xi1> to vector<1x8xi1>
    %17 = vector.broadcast %16 : vector<1x8xi1> to vector<8x8xi1>
    %18 = vector.broadcast %cst_17 : f32 to vector<8x8xf32>
    %19 = arith.select %17, %11, %18 : vector<8x8xi1>, vector<8x8xf32>
    %c0_18 = arith.constant 0 : index
    %c0_19 = arith.constant 0 : index
    %20 = vector.load %arg9[%c0_18, %c0_19] : memref<8x1xf32, #tpu.memory_space<vmem>>, vector<8x1xf32>
    %cst_20 = arith.constant dense<0xFF800000> : vector<8xf32>
    %21 = vector.multi_reduction <maximumf>, %19, %cst_20 [1] : vector<8x8xf32> to vector<8xf32>
    %22 = vector.shape_cast %21 : vector<8xf32> to vector<8x1xf32>
    %23 = arith.maximumf %20, %22 : vector<8x1xf32>
    %24 = arith.subf %20, %23 : vector<8x1xf32>
    %25 = math.exp %24 : vector<8x1xf32>
    %26 = vector.broadcast %23 : vector<8x1xf32> to vector<8x8xf32>
    %27 = arith.subf %19, %26 : vector<8x8xf32>
    %28 = math.exp %27 : vector<8x8xf32>
    %c0_21 = arith.constant 0 : index
    %c0_22 = arith.constant 0 : index
    %29 = vector.load %arg10[%c0_21, %c0_22] : memref<8x1xf32, #tpu.memory_space<vmem>>, vector<8x1xf32>
    %30 = arith.mulf %25, %29 : vector<8x1xf32>
    %cst_23 = arith.constant dense<0.000000e+00> : vector<8xf32>
    %31 = vector.multi_reduction <add>, %28, %cst_23 [1] : vector<8x8xf32> to vector<8xf32>
    %32 = vector.shape_cast %31 : vector<8xf32> to vector<8x1xf32>
    %33 = arith.addf %30, %32 : vector<8x1xf32>
    %c0_24 = arith.constant 0 : index
    %c0_25 = arith.constant 0 : index
    %34 = vector.load %arg10[%c0_24, %c0_25] : memref<8x1xf32, #tpu.memory_space<vmem>>, vector<8x1xf32>
    tpu.vector_store %arg10[%c0_24, %c0_25], %33 {strides = array<i32>} : memref<8x1xf32, #tpu.memory_space<vmem>>, vector<8x1xf32>,
    %c0_26 = arith.constant 0 : index
    %c0_27 = arith.constant 0 : index
    %35 = vector.load %arg11[%c0_26, %c0_27] : memref<8x8xf32, #tpu.memory_space<vmem>>, vector<8x8xf32>
    %36 = vector.broadcast %25 : vector<8x1xf32> to vector<8x8xf32>
    %37 = arith.mulf %36, %35 : vector<8x8xf32>
    %38 = arith.truncf %28 : vector<8x8xf32> to vector<8x8xbf16>
    %cst_28 = arith.constant dense<0.000000e+00> : vector<8x8xf32>
    %39 = tpu.matmul %38, %8, %cst_28 {dimension_numbers = #tpu.dot_dimension_numbers<[1], [0], [0], [1], [0, 0, 1, 1], [], []>} : vector<8x8xbf16>, vector<8x8xbf16>, vector<8x8xf32> -> vector<8x8xf32>
    %40 = arith.addf %37, %39 : vector<8x8xf32>
    %c0_29 = arith.constant 0 : index
    %c0_30 = arith.constant 0 : index
    %41 = vector.load %arg11[%c0_29, %c0_30] : memref<8x8xf32, #tpu.memory_space<vmem>>, vector<8x8xf32>
    tpu.vector_store %arg11[%c0_29, %c0_30], %40 {strides = array<i32>} : memref<8x8xf32, #tpu.memory_space<vmem>>, vector<8x8xf32>,
    %c0_31 = arith.constant 0 : index
    %c0_32 = arith.constant 0 : index
    %42 = vector.load %arg9[%c0_31, %c0_32] : memref<8x1xf32, #tpu.memory_space<vmem>>, vector<8x1xf32>
    tpu.vector_store %arg9[%c0_31, %c0_32], %23 {strides = array<i32>} : memref<8x1xf32, #tpu.memory_space<vmem>>, vector<8x1xf32>,
    %c0_i32_33 = arith.constant 0 : i32
    %43 = arith.cmpi eq, %arg3, %c0_i32_33 : i32
    %44 = arith.extui %43 : i1 to i32
    %c0_i32_34 = arith.constant 0 : i32
    %45 = arith.cmpi ne, %44, %c0_i32_34 : i32
    scf.if %45 {
      %c0_35 = arith.constant 0 : index
      %c0_36 = arith.constant 0 : index
      %46 = vector.load %arg10[%c0_35, %c0_36] : memref<8x1xf32, #tpu.memory_space<vmem>>, vector<8x1xf32>
      %47 = tpu.reciprocal %46 {approx = true} : vector<8x1xf32> -> vector<8x1xf32>
      %c0_37 = arith.constant 0 : index
      %c0_38 = arith.constant 0 : index
      %48 = vector.load %arg11[%c0_37, %c0_38] : memref<8x8xf32, #tpu.memory_space<vmem>>, vector<8x8xf32>
      %49 = vector.broadcast %47 : vector<8x1xf32> to vector<8x8xf32>
      %50 = arith.mulf %48, %49 : vector<8x8xf32>
      %51 = arith.truncf %50 : vector<8x8xf32> to vector<8x8xbf16>
      %c0_39 = arith.constant 0 : index
      %c0_40 = arith.constant 0 : index
      %c0_41 = arith.constant 0 : index
      %c0_42 = arith.constant 0 : index
      %52 = vector.load %arg8[%c0_39, %c0_40, %c0_41, %c0_42] : memref<1x1x8x8xbf16, #tpu.memory_space<vmem>>, vector<1x1x8x8xbf16>
      %53 = vector.shape_cast %52 : vector<1x1x8x8xbf16> to vector<8x8xbf16>
      %54 = vector.shape_cast %51 : vector<8x8xbf16> to vector<1x1x8x8xbf16>
      tpu.vector_store %arg8[%c0_39, %c0_40, %c0_41, %c0_42], %54 {strides = array<i32>} : memref<1x1x8x8xbf16, #tpu.memory_space<vmem>>, vector<1x1x8x8xbf16>,
    } else {
    }
    return
  }
  func.func @transform_0(%arg0: i32, %arg1: i32, %arg2: i32, %arg3: i32) -> (i32, i32, i32, i32) {
    %c0_i32 = arith.constant 0 : i32
    %c0_i32_0 = arith.constant 0 : i32
    return %arg0, %arg1, %arg2, %c0_i32 : i32, i32, i32, i32
  }
  func.func @transform_1(%arg0: i32, %arg1: i32, %arg2: i32, %arg3: i32) -> (i32, i32, i32, i32) {
    %c0_i32 = arith.constant 0 : i32
    %c0_i32_0 = arith.constant 0 : i32
    return %arg0, %arg1, %arg3, %c0_i32 : i32, i32, i32, i32
  }
  func.func @transform_2(%arg0: i32, %arg1: i32, %arg2: i32, %arg3: i32) -> (i32, i32, i32, i32) {
    %c0_i32 = arith.constant 0 : i32
    %c0_i32_0 = arith.constant 0 : i32
    return %arg0, %arg1, %arg3, %c0_i32 : i32, i32, i32, i32
  }
  func.func @transform_3(%arg0: i32, %arg1: i32, %arg2: i32, %arg3: i32) -> (i32, i32, i32) {
    %c0_i32 = arith.constant 0 : i32
    %c0_i32_0 = arith.constant 0 : i32
    return %arg0, %c0_i32, %arg3 : i32, i32, i32
  }
  func.func @transform_4(%arg0: i32, %arg1: i32, %arg2: i32, %arg3: i32) -> (i32, i32, i32, i32) {
    %c0_i32 = arith.constant 0 : i32
    %c0_i32_0 = arith.constant 0 : i32
    return %arg0, %arg1, %arg2, %c0_i32 : i32, i32, i32, i32
  }
}

module attributes {stable_mosaic.version = 11 : i64} {
  func.func @kernel(%arg0: i32, %arg1: i32, %arg2: i32, %arg3: memref<16x32xbf16, #tpu.memory_space<vmem>>, %arg4: memref<32x32xbf16, #tpu.memory_space<vmem>>, %arg5: memref<1x32xf32, #tpu.memory_space<vmem>>, %arg6: memref<16x32xbf16, #tpu.memory_space<vmem>>, %arg7: memref<16x32xbf16, #tpu.memory_space<vmem>>, %arg8: memref<16x32xf32, #tpu.memory_space<vmem>>) attributes {dimension_semantics = [#tpu.dimension_semantics<parallel>, #tpu.dimension_semantics<parallel>, #tpu.dimension_semantics<arbitrary>], iteration_bounds = array<i64: 1, 1, 1>, scalar_prefetch = 0 : i64, scratch_operands = 1 : i64, tpu.core_type = #tpu.core_type<tc>, window_params = [{transform_indices = @transform_0, window_bounds = array<i64: 16, 32>}, {transform_indices = @transform_1, window_bounds = array<i64: 32, 32>}, {transform_indices = @transform_2, window_bounds = array<i64: 1, 32>}, {transform_indices = @transform_3, window_bounds = array<i64: 16, 32>}, {transform_indices = @transform_4, window_bounds = array<i64: 16, 32>}]} {
    %c0_i32 = arith.constant 0 : i32
    %0 = arith.cmpi eq, %arg2, %c0_i32 : i32
    %1 = arith.extui %0 : i1 to i32
    %c0_i32_0 = arith.constant 0 : i32
    %2 = arith.cmpi ne, %1, %c0_i32_0 : i32
    scf.if %2 {
      %cst_10 = arith.constant 0.000000e+00 : f32
      %12 = vector.broadcast %cst_10 : f32 to vector<16x32xf32>
      %c0_11 = arith.constant 0 : index
      %c0_12 = arith.constant 0 : index
      %13 = vector.load %arg8[%c0_11, %c0_12] : memref<16x32xf32, #tpu.memory_space<vmem>>, vector<16x32xf32>
      tpu.vector_store %arg8[%c0_11, %c0_12], %12 {strides = array<i32>} : memref<16x32xf32, #tpu.memory_space<vmem>>, vector<16x32xf32>,
    } else {
    }
    %c0 = arith.constant 0 : index
    %c0_1 = arith.constant 0 : index
    %3 = vector.load %arg8[%c0, %c0_1] : memref<16x32xf32, #tpu.memory_space<vmem>>, vector<16x32xf32>
    %c0_2 = arith.constant 0 : index
    %c0_3 = arith.constant 0 : index
    %4 = vector.load %arg3[%c0_2, %c0_3] : memref<16x32xbf16, #tpu.memory_space<vmem>>, vector<16x32xbf16>
    %c0_4 = arith.constant 0 : index
    %c0_5 = arith.constant 0 : index
    %5 = vector.load %arg4[%c0_4, %c0_5] : memref<32x32xbf16, #tpu.memory_space<vmem>>, vector<32x32xbf16>
    %cst = arith.constant dense<0.000000e+00> : vector<16x32xf32>
    %6 = tpu.matmul %4, %5, %cst {dimension_numbers = #tpu.dot_dimension_numbers<[1], [0], [0], [1], [0, 0, 1, 1], [], []>} : vector<16x32xbf16>, vector<32x32xbf16>, vector<16x32xf32> -> vector<16x32xf32>
    %7 = arith.addf %3, %6 : vector<16x32xf32>
    %c0_6 = arith.constant 0 : index
    %c0_7 = arith.constant 0 : index
    %8 = vector.load %arg8[%c0_6, %c0_7] : memref<16x32xf32, #tpu.memory_space<vmem>>, vector<16x32xf32>
    tpu.vector_store %arg8[%c0_6, %c0_7], %7 {strides = array<i32>} : memref<16x32xf32, #tpu.memory_space<vmem>>, vector<16x32xf32>,
    %c0_i32_8 = arith.constant 0 : i32
    %9 = arith.cmpi eq, %arg2, %c0_i32_8 : i32
    %10 = arith.extui %9 : i1 to i32
    %c0_i32_9 = arith.constant 0 : i32
    %11 = arith.cmpi ne, %10, %c0_i32_9 : i32
    scf.if %11 {
      %c0_10 = arith.constant 0 : index
      %c0_11 = arith.constant 0 : index
      %12 = vector.load %arg8[%c0_10, %c0_11] : memref<16x32xf32, #tpu.memory_space<vmem>>, vector<16x32xf32>
      %c0_12 = arith.constant 0 : index
      %c0_13 = arith.constant 0 : index
      %13 = vector.load %arg5[%c0_12, %c0_13] : memref<1x32xf32, #tpu.memory_space<vmem>>, vector<1x32xf32>
      %14 = vector.broadcast %13 : vector<1x32xf32> to vector<16x32xf32>
      %15 = arith.addf %12, %14 : vector<16x32xf32>
      %c0_14 = arith.constant 0 : index
      %c0_15 = arith.constant 0 : index
      %16 = vector.load %arg6[%c0_14, %c0_15] : memref<16x32xbf16, #tpu.memory_space<vmem>>, vector<16x32xbf16>
      %17 = arith.extf %16 : vector<16x32xbf16> to vector<16x32xf32>
      %18 = arith.addf %15, %17 : vector<16x32xf32>
      %19 = arith.truncf %18 : vector<16x32xf32> to vector<16x32xbf16>
      %c0_16 = arith.constant 0 : index
      %c0_17 = arith.constant 0 : index
      %20 = vector.load %arg7[%c0_16, %c0_17] : memref<16x32xbf16, #tpu.memory_space<vmem>>, vector<16x32xbf16>
      tpu.vector_store %arg7[%c0_16, %c0_17], %19 {strides = array<i32>} : memref<16x32xbf16, #tpu.memory_space<vmem>>, vector<16x32xbf16>,
    } else {
    }
    return
  }
  func.func @transform_0(%arg0: i32, %arg1: i32, %arg2: i32) -> (i32, i32) {
    %c0_i32 = arith.constant 0 : i32
    return %arg0, %arg2 : i32, i32
  }
  func.func @transform_1(%arg0: i32, %arg1: i32, %arg2: i32) -> (i32, i32) {
    %c0_i32 = arith.constant 0 : i32
    return %arg2, %arg1 : i32, i32
  }
  func.func @transform_2(%arg0: i32, %arg1: i32, %arg2: i32) -> (i32, i32) {
    %c0_i32 = arith.constant 0 : i32
    %c0_i32_0 = arith.constant 0 : i32
    return %c0_i32, %arg1 : i32, i32
  }
  func.func @transform_3(%arg0: i32, %arg1: i32, %arg2: i32) -> (i32, i32) {
    %c0_i32 = arith.constant 0 : i32
    return %arg0, %arg1 : i32, i32
  }
  func.func @transform_4(%arg0: i32, %arg1: i32, %arg2: i32) -> (i32, i32) {
    %c0_i32 = arith.constant 0 : i32
    return %arg0, %arg1 : i32, i32
  }
}

module attributes {stable_mosaic.version = 11 : i64} {
  func.func @kernel(%arg0: i32, %arg1: i32, %arg2: i32, %arg3: memref<16x32xbf16, #tpu.memory_space<vmem>>, %arg4: memref<32x64xbf16, #tpu.memory_space<vmem>>, %arg5: memref<1x64xf32, #tpu.memory_space<vmem>>, %arg6: memref<16x64xbf16, #tpu.memory_space<vmem>>, %arg7: memref<16x64xf32, #tpu.memory_space<vmem>>) attributes {dimension_semantics = [#tpu.dimension_semantics<parallel>, #tpu.dimension_semantics<parallel>, #tpu.dimension_semantics<arbitrary>], iteration_bounds = array<i64: 1, 1, 1>, scalar_prefetch = 0 : i64, scratch_operands = 1 : i64, tpu.core_type = #tpu.core_type<tc>, window_params = [{transform_indices = @transform_0, window_bounds = array<i64: 16, 32>}, {transform_indices = @transform_1, window_bounds = array<i64: 32, 64>}, {transform_indices = @transform_2, window_bounds = array<i64: 1, 64>}, {transform_indices = @transform_3, window_bounds = array<i64: 16, 64>}]} {
    %c0_i32 = arith.constant 0 : i32
    %0 = arith.cmpi eq, %arg2, %c0_i32 : i32
    %1 = arith.extui %0 : i1 to i32
    %c0_i32_0 = arith.constant 0 : i32
    %2 = arith.cmpi ne, %1, %c0_i32_0 : i32
    scf.if %2 {
      %cst_10 = arith.constant 0.000000e+00 : f32
      %12 = vector.broadcast %cst_10 : f32 to vector<16x64xf32>
      %c0_11 = arith.constant 0 : index
      %c0_12 = arith.constant 0 : index
      %13 = vector.load %arg7[%c0_11, %c0_12] : memref<16x64xf32, #tpu.memory_space<vmem>>, vector<16x64xf32>
      tpu.vector_store %arg7[%c0_11, %c0_12], %12 {strides = array<i32>} : memref<16x64xf32, #tpu.memory_space<vmem>>, vector<16x64xf32>,
    } else {
    }
    %c0 = arith.constant 0 : index
    %c0_1 = arith.constant 0 : index
    %3 = vector.load %arg7[%c0, %c0_1] : memref<16x64xf32, #tpu.memory_space<vmem>>, vector<16x64xf32>
    %c0_2 = arith.constant 0 : index
    %c0_3 = arith.constant 0 : index
    %4 = vector.load %arg3[%c0_2, %c0_3] : memref<16x32xbf16, #tpu.memory_space<vmem>>, vector<16x32xbf16>
    %c0_4 = arith.constant 0 : index
    %c0_5 = arith.constant 0 : index
    %5 = vector.load %arg4[%c0_4, %c0_5] : memref<32x64xbf16, #tpu.memory_space<vmem>>, vector<32x64xbf16>
    %cst = arith.constant dense<0.000000e+00> : vector<16x64xf32>
    %6 = tpu.matmul %4, %5, %cst {dimension_numbers = #tpu.dot_dimension_numbers<[1], [0], [0], [1], [0, 0, 1, 1], [], []>} : vector<16x32xbf16>, vector<32x64xbf16>, vector<16x64xf32> -> vector<16x64xf32>
    %7 = arith.addf %3, %6 : vector<16x64xf32>
    %c0_6 = arith.constant 0 : index
    %c0_7 = arith.constant 0 : index
    %8 = vector.load %arg7[%c0_6, %c0_7] : memref<16x64xf32, #tpu.memory_space<vmem>>, vector<16x64xf32>
    tpu.vector_store %arg7[%c0_6, %c0_7], %7 {strides = array<i32>} : memref<16x64xf32, #tpu.memory_space<vmem>>, vector<16x64xf32>,
    %c0_i32_8 = arith.constant 0 : i32
    %9 = arith.cmpi eq, %arg2, %c0_i32_8 : i32
    %10 = arith.extui %9 : i1 to i32
    %c0_i32_9 = arith.constant 0 : i32
    %11 = arith.cmpi ne, %10, %c0_i32_9 : i32
    scf.if %11 {
      %c0_10 = arith.constant 0 : index
      %c0_11 = arith.constant 0 : index
      %12 = vector.load %arg7[%c0_10, %c0_11] : memref<16x64xf32, #tpu.memory_space<vmem>>, vector<16x64xf32>
      %c0_12 = arith.constant 0 : index
      %c0_13 = arith.constant 0 : index
      %13 = vector.load %arg5[%c0_12, %c0_13] : memref<1x64xf32, #tpu.memory_space<vmem>>, vector<1x64xf32>
      %14 = vector.broadcast %13 : vector<1x64xf32> to vector<16x64xf32>
      %15 = arith.addf %12, %14 : vector<16x64xf32>
      %cst_14 = arith.constant 5.000000e-01 : f32
      %16 = vector.broadcast %cst_14 : f32 to vector<16x64xf32>
      %17 = arith.mulf %16, %15 : vector<16x64xf32>
      %cst_15 = arith.constant 0.707106769 : f32
      %18 = vector.broadcast %cst_15 : f32 to vector<16x64xf32>
      %19 = arith.mulf %15, %18 : vector<16x64xf32>
      %cst_16 = arith.constant 0.000000e+00 : f32
      %20 = vector.broadcast %cst_16 : f32 to vector<16x64xf32>
      %21 = arith.cmpf oge, %19, %20 : vector<16x64xf32>
      %cst_17 = arith.constant 1.000000e+00 : f32
      %cst_18 = arith.constant -1.000000e+00 : f32
      %22 = vector.broadcast %cst_17 : f32 to vector<16x64xf32>
      %23 = vector.broadcast %cst_18 : f32 to vector<16x64xf32>
      %24 = arith.select %21, %22, %23 : vector<16x64xi1>, vector<16x64xf32>
      %25 = math.absf %19 : vector<16x64xf32>
      %cst_19 = arith.constant 0.327591091 : f32
      %26 = vector.broadcast %cst_19 : f32 to vector<16x64xf32>
      %27 = arith.mulf %26, %25 : vector<16x64xf32>
      %cst_20 = arith.constant 1.000000e+00 : f32
      %28 = vector.broadcast %cst_20 : f32 to vector<16x64xf32>
      %29 = arith.addf %28, %27 : vector<16x64xf32>
      %cst_21 = arith.constant 1.000000e+00 : f32
      %30 = vector.broadcast %cst_21 : f32 to vector<16x64xf32>
      %31 = arith.divf %30, %29 : vector<16x64xf32>
      %cst_22 = arith.constant 1.06140542 : f32
      %32 = vector.broadcast %cst_22 : f32 to vector<16x64xf32>
      %33 = arith.mulf %32, %31 : vector<16x64xf32>
      %cst_23 = arith.constant -1.45315206 : f32
      %34 = vector.broadcast %cst_23 : f32 to vector<16x64xf32>
      %35 = arith.addf %33, %34 : vector<16x64xf32>
      %36 = arith.mulf %35, %31 : vector<16x64xf32>
      %cst_24 = arith.constant 1.42141378 : f32
      %37 = vector.broadcast %cst_24 : f32 to vector<16x64xf32>
      %38 = arith.addf %36, %37 : vector<16x64xf32>
      %39 = arith.mulf %38, %31 : vector<16x64xf32>
      %cst_25 = arith.constant -0.284496725 : f32
      %40 = vector.broadcast %cst_25 : f32 to vector<16x64xf32>
      %41 = arith.addf %39, %40 : vector<16x64xf32>
      %42 = arith.mulf %41, %31 : vector<16x64xf32>
      %cst_26 = arith.constant 0.254829586 : f32
      %43 = vector.broadcast %cst_26 : f32 to vector<16x64xf32>
      %44 = arith.addf %42, %43 : vector<16x64xf32>
      %45 = arith.mulf %44, %31 : vector<16x64xf32>
      %cst_27 = arith.constant 0.000000e+00 : f32
      %46 = vector.broadcast %cst_27 : f32 to vector<16x64xf32>
      %47 = arith.subf %46, %25 : vector<16x64xf32>
      %48 = arith.mulf %47, %25 : vector<16x64xf32>
      %49 = math.exp %48 : vector<16x64xf32>
      %50 = arith.mulf %45, %49 : vector<16x64xf32>
      %cst_28 = arith.constant 1.000000e+00 : f32
      %51 = vector.broadcast %cst_28 : f32 to vector<16x64xf32>
      %52 = arith.subf %51, %50 : vector<16x64xf32>
      %53 = arith.mulf %24, %52 : vector<16x64xf32>
      %cst_29 = arith.constant 1.000000e+00 : f32
      %54 = vector.broadcast %cst_29 : f32 to vector<16x64xf32>
      %55 = arith.addf %54, %53 : vector<16x64xf32>
      %56 = arith.mulf %17, %55 : vector<16x64xf32>
      %57 = arith.truncf %56 : vector<16x64xf32> to vector<16x64xbf16>
      %c0_30 = arith.constant 0 : index
      %c0_31 = arith.constant 0 : index
      %58 = vector.load %arg6[%c0_30, %c0_31] : memref<16x64xbf16, #tpu.memory_space<vmem>>, vector<16x64xbf16>
      tpu.vector_store %arg6[%c0_30, %c0_31], %57 {strides = array<i32>} : memref<16x64xbf16, #tpu.memory_space<vmem>>, vector<16x64xbf16>,
    } else {
    }
    return
  }
  func.func @transform_0(%arg0: i32, %arg1: i32, %arg2: i32) -> (i32, i32) {
    %c0_i32 = arith.constant 0 : i32
    return %arg0, %arg2 : i32, i32
  }
  func.func @transform_1(%arg0: i32, %arg1: i32, %arg2: i32) -> (i32, i32) {
    %c0_i32 = arith.constant 0 : i32
    return %arg2, %arg1 : i32, i32
  }
  func.func @transform_2(%arg0: i32, %arg1: i32, %arg2: i32) -> (i32, i32) {
    %c0_i32 = arith.constant 0 : i32
    %c0_i32_0 = arith.constant 0 : i32
    return %c0_i32, %arg1 : i32, i32
  }
  func.func @transform_3(%arg0: i32, %arg1: i32, %arg2: i32) -> (i32, i32) {
    %c0_i32 = arith.constant 0 : i32
    return %arg0, %arg1 : i32, i32
  }
}

module attributes {stable_mosaic.version = 11 : i64} {
  func.func @kernel(%arg0: i32, %arg1: i32, %arg2: i32, %arg3: memref<16x64xbf16, #tpu.memory_space<vmem>>, %arg4: memref<64x32xbf16, #tpu.memory_space<vmem>>, %arg5: memref<1x32xf32, #tpu.memory_space<vmem>>, %arg6: memref<16x32xbf16, #tpu.memory_space<vmem>>, %arg7: memref<16x32xbf16, #tpu.memory_space<vmem>>, %arg8: memref<16x32xf32, #tpu.memory_space<vmem>>) attributes {dimension_semantics = [#tpu.dimension_semantics<parallel>, #tpu.dimension_semantics<parallel>, #tpu.dimension_semantics<arbitrary>], iteration_bounds = array<i64: 1, 1, 1>, scalar_prefetch = 0 : i64, scratch_operands = 1 : i64, tpu.core_type = #tpu.core_type<tc>, window_params = [{transform_indices = @transform_0, window_bounds = array<i64: 16, 64>}, {transform_indices = @transform_1, window_bounds = array<i64: 64, 32>}, {transform_indices = @transform_2, window_bounds = array<i64: 1, 32>}, {transform_indices = @transform_3, window_bounds = array<i64: 16, 32>}, {transform_indices = @transform_4, window_bounds = array<i64: 16, 32>}]} {
    %c0_i32 = arith.constant 0 : i32
    %0 = arith.cmpi eq, %arg2, %c0_i32 : i32
    %1 = arith.extui %0 : i1 to i32
    %c0_i32_0 = arith.constant 0 : i32
    %2 = arith.cmpi ne, %1, %c0_i32_0 : i32
    scf.if %2 {
      %cst_10 = arith.constant 0.000000e+00 : f32
      %12 = vector.broadcast %cst_10 : f32 to vector<16x32xf32>
      %c0_11 = arith.constant 0 : index
      %c0_12 = arith.constant 0 : index
      %13 = vector.load %arg8[%c0_11, %c0_12] : memref<16x32xf32, #tpu.memory_space<vmem>>, vector<16x32xf32>
      tpu.vector_store %arg8[%c0_11, %c0_12], %12 {strides = array<i32>} : memref<16x32xf32, #tpu.memory_space<vmem>>, vector<16x32xf32>,
    } else {
    }
    %c0 = arith.constant 0 : index
    %c0_1 = arith.constant 0 : index
    %3 = vector.load %arg8[%c0, %c0_1] : memref<16x32xf32, #tpu.memory_space<vmem>>, vector<16x32xf32>
    %c0_2 = arith.constant 0 : index
    %c0_3 = arith.constant 0 : index
    %4 = vector.load %arg3[%c0_2, %c0_3] : memref<16x64xbf16, #tpu.memory_space<vmem>>, vector<16x64xbf16>
    %c0_4 = arith.constant 0 : index
    %c0_5 = arith.constant 0 : index
    %5 = vector.load %arg4[%c0_4, %c0_5] : memref<64x32xbf16, #tpu.memory_space<vmem>>, vector<64x32xbf16>
    %cst = arith.constant dense<0.000000e+00> : vector<16x32xf32>
    %6 = tpu.matmul %4, %5, %cst {dimension_numbers = #tpu.dot_dimension_numbers<[1], [0], [0], [1], [0, 0, 1, 1], [], []>} : vector<16x64xbf16>, vector<64x32xbf16>, vector<16x32xf32> -> vector<16x32xf32>
    %7 = arith.addf %3, %6 : vector<16x32xf32>
    %c0_6 = arith.constant 0 : index
    %c0_7 = arith.constant 0 : index
    %8 = vector.load %arg8[%c0_6, %c0_7] : memref<16x32xf32, #tpu.memory_space<vmem>>, vector<16x32xf32>
    tpu.vector_store %arg8[%c0_6, %c0_7], %7 {strides = array<i32>} : memref<16x32xf32, #tpu.memory_space<vmem>>, vector<16x32xf32>,
    %c0_i32_8 = arith.constant 0 : i32
    %9 = arith.cmpi eq, %arg2, %c0_i32_8 : i32
    %10 = arith.extui %9 : i1 to i32
    %c0_i32_9 = arith.constant 0 : i32
    %11 = arith.cmpi ne, %10, %c0_i32_9 : i32
    scf.if %11 {
      %c0_10 = arith.constant 0 : index
      %c0_11 = arith.constant 0 : index
      %12 = vector.load %arg8[%c0_10, %c0_11] : memref<16x32xf32, #tpu.memory_space<vmem>>, vector<16x32xf32>
      %c0_12 = arith.constant 0 : index
      %c0_13 = arith.constant 0 : index
      %13 = vector.load %arg5[%c0_12, %c0_13] : memref<1x32xf32, #tpu.memory_space<vmem>>, vector<1x32xf32>
      %14 = vector.broadcast %13 : vector<1x32xf32> to vector<16x32xf32>
      %15 = arith.addf %12, %14 : vector<16x32xf32>
      %c0_14 = arith.constant 0 : index
      %c0_15 = arith.constant 0 : index
      %16 = vector.load %arg6[%c0_14, %c0_15] : memref<16x32xbf16, #tpu.memory_space<vmem>>, vector<16x32xbf16>
      %17 = arith.extf %16 : vector<16x32xbf16> to vector<16x32xf32>
      %18 = arith.addf %15, %17 : vector<16x32xf32>
      %19 = arith.truncf %18 : vector<16x32xf32> to vector<16x32xbf16>
      %c0_16 = arith.constant 0 : index
      %c0_17 = arith.constant 0 : index
      %20 = vector.load %arg7[%c0_16, %c0_17] : memref<16x32xbf16, #tpu.memory_space<vmem>>, vector<16x32xbf16>
      tpu.vector_store %arg7[%c0_16, %c0_17], %19 {strides = array<i32>} : memref<16x32xbf16, #tpu.memory_space<vmem>>, vector<16x32xbf16>,
    } else {
    }
    return
  }
  func.func @transform_0(%arg0: i32, %arg1: i32, %arg2: i32) -> (i32, i32) {
    %c0_i32 = arith.constant 0 : i32
    return %arg0, %arg2 : i32, i32
  }
  func.func @transform_1(%arg0: i32, %arg1: i32, %arg2: i32) -> (i32, i32) {
    %c0_i32 = arith.constant 0 : i32
    return %arg2, %arg1 : i32, i32
  }
  func.func @transform_2(%arg0: i32, %arg1: i32, %arg2: i32) -> (i32, i32) {
    %c0_i32 = arith.constant 0 : i32
    %c0_i32_0 = arith.constant 0 : i32
    return %c0_i32, %arg1 : i32, i32
  }
  func.func @transform_3(%arg0: i32, %arg1: i32, %arg2: i32) -> (i32, i32) {
    %c0_i32 = arith.constant 0 : i32
    return %arg0, %arg1 : i32, i32
  }
  func.func @transform_4(%arg0: i32, %arg1: i32, %arg2: i32) -> (i32, i32) {
    %c0_i32 = arith.constant 0 : i32
    return %arg0, %arg1 : i32, i32
  }
}

</mosaic_0001>

<bundles_post_ra>
// kernel: _lambda_.15
= control target key start
LH: loop header
LB: loop body
LE: loop exit
PB: predicated region body
PF: predicated region fallthrough
CT: control target
= control target key end

     0   :  { %vm18_vm0 = vcmask 261120   ;;  %vm72_vm1 = vcmask 257024   ;;  %s132_s0 = inlined_call_operand.vmem [shape: bf16[16,32], index: 0, kind: input, shape index: {}]   ;;  %s133_s1 = inlined_call_operand.vmem [shape: f32[1,32], index: 1, kind: input, shape index: {}]   ;;  %s134_s2 = inlined_call_operand.vmem [shape: f32[1,32], index: 2, kind: input, shape index: {}]   ;;  %s135_s3 = inlined_call_operand.vmem [shape: bf16[16,32], index: 3, kind: output, shape index: {}]  }
   0x1   :  { %v86_v0 = vld [vmem:[%s132_s0] sm:$0xff]  }
   0x2   :  { %v87_v1 = vunpack.c.l.bf16 %v86_v0  ;;  %v88_v2 = vunpack.c.h.bf16 %v86_v0  ;;  %v79_v22 = vld [vmem:[%s133_s1] ss:$0 sm:$0xff] }
   0x3   :  { %v80_v24 = vld [vmem:[%s134_s2] ss:$0 sm:$0xff] }
   0x4   :  { %v19_v3 = vsel %vm18_vm0, %v87_v1, 0.0  ;;  %v22_v4 = vsel %vm18_vm0, %v88_v2, 0.0 }
   0x5   :  { %20 = vadd.xlane.f32.xlu0 %v19_v3 }
   0x9   :  { %23 = vadd.xlane.f32.xlu0 %v22_v4 }
  0x8e   :  { %v21_v5 = vpop.xlane.xlu0 %20 }
  0x8f   :  { %v26_v6 = vmul.f32 0.03125, %v21_v5 }
  0x91   :  { %v28_v7 = vsub.f32 %v87_v1, %v26_v6 }
  0x92   :  { %v24_v8 = vpop.xlane.xlu0 %23 }
  0x93   :  { %v27_v9 = vmul.f32 0.03125, %v24_v8  ;;  %v30_v10 = vmul.f32 %v28_v7, %v28_v7 }
  0x95   :  { %v29_v11 = vsub.f32 %v88_v2, %v27_v9  ;;  %v32_v12 = vsel %vm18_vm0, %v30_v10, 0.0 }
  0x96   :  { %33 = vadd.xlane.f32.xlu1 %v32_v12 }
  0x97   :  { %v31_v13 = vmul.f32 %v29_v11, %v29_v11 }
  0x99   :  { %v35_v14 = vsel %vm18_vm0, %v31_v13, 0.0 }
  0x9a   :  { %36 = vadd.xlane.f32.xlu1 %v35_v14 }
 0x11f   :  { %v34_v15 = vpop.xlane.xlu1 %33 }
 0x120   :  { %v38_v16 = vmul.f32 0.03125, %v34_v15 }
 0x122   :  { %v40_v17 = vadd.f32 1e-12, %v38_v16 }
 0x123   :  { %v37_v18 = vpop.xlane.xlu1 %36 }
 0x124   :  { %89 = vrsqrt.f32 %v40_v17  ;;  %v39_v19 = vmul.f32 0.03125, %v37_v18 }
 0x126   :  { %v41_v20 = vadd.f32 1e-12, %v39_v19 }
 0x128   :  { %91 = vrsqrt.f32 %v41_v20 }
 0x131   :  { %v90_v21 = vpop.eup %89 }
 0x132   :  { %v44_v23 = vmul.f32 %v90_v21, %v28_v7 }
 0x134   :  { %v53_v25 = vmul.f32 %v79_v22, %v44_v23 }
 0x135   :  { %v92_v26 = vpop.eup %91 }
 0x136   :  { %v62_v27 = vadd.f32 %v80_v24, %v53_v25  ;;  %v45_v28 = vmul.f32 %v92_v26, %v29_v11 }
 0x138   :  { %v83_v29 = vpack.c.bf16 %v62_v27, %v62_v27  ;;  %v54_v30 = vmul.f32 %v79_v22, %v45_v28 }
 0x13a   :  { %73 = vst.msk [vmem:[%s135_s3] sm:$0xf] %vm72_vm1, %v83_v29  ;;  %v63_v31 = vadd.f32 %v80_v24, %v54_v30 }
 0x13c   :  { %v84_v32 = vpack.c.bf16 %v63_v31, %v63_v31 }
 0x13e   :  { %74 = vst.msk [vmem:[%s135_s3 + $0x4] sm:$0xf] %vm72_vm1, %v84_v32 }

// kernel: _lambda_.17
= control target key start
LH: loop header
LB: loop body
LE: loop exit
PB: predicated region body
PF: predicated region fallthrough
CT: control target
= control target key end

     0   :  { %vm19_vm0 = vcmask 785408   ;;  %v151_v0 = vmov 0.0   ;;  %vm152_vm1 = vmmov 0   ;;  %vm47_vm2 = vcmask 261120   ;;  %s195_s1 = inlined_call_operand.vmem [shape: bf16[32,96], index: 1, kind: input, shape index: {}]   ;;  %s196_s0 = inlined_call_operand.vmem [shape: bf16[16,32], index: 0, kind: input, shape index: {}]   ;;  %s197_s2 = inlined_call_operand.vmem [shape: f32[1,96], index: 2, kind: input, shape index: {}]   ;;  %s198_s3 = inlined_call_operand.vmem [shape: bf16[16,96], index: 3, kind: output, shape index: {}]  }
   0x1   :  { %138 = vmatprep.subr.bf16.mxu0 %v151_v0  ;;  %v148_v1 = vld [vmem:[%s195_s1 + $0x8] sm:$0xff]   ;;  %142 = vmatprep.mubr.msk.bf16.mxu0 %vm152_vm1, %v151_v0  ;;  %20 = vst.msk [vmem:[#allocation2] sm:$0xff] %vm19_vm0, %v151_v0  ;;  %21 = vst.msk [vmem:[#allocation2 + $0x8] sm:$0xff] %vm19_vm0, %v151_v0  ;;  %v149_v2 = vld [vmem:[%s195_s1] sm:$0xff]   ;;  %vm119_vm3 = vcmask 781312  }
   0x2   :  { %139 = vmatpush3.bf16.msra.mxu0 %v148_v1  ;;  %v150_v3 = vld [vmem:[%s196_s0] sm:$0xff]  }
   0x3   :  { %140 = vmatprep.subr.bf16.mxu0 %v151_v0  ;;  %v130_v12 = vld [vmem:[%s197_s2] ss:$0 sm:$0xff] }
   0x6   :  { %141 = vmatpush3.bf16.msra.mxu0 %v149_v2 }
   0x8   :  { %v22_v4 = vld [vmem:[#allocation2] sm:$0xff]  ;;  %v23_v8 = vld [vmem:[#allocation2 + $0x8] sm:$0xff] }
   0x9   :  { %143 = vmatmul.mubr.msk.bf16.vlgmr.msra.gmra.mxu0 %vm47_vm2, %v150_v3 }
  0xc9   :  { %v85_v5 = vpop.f32.mrf.mxu0 }
  0xca   :  { %v92_v6 = vadd.f32 %v85_v5, %v22_v4 }
  0xcb   :  { %v144_v7 = vpop.f32.mrf.mxu0 }
  0xcc   :  { %95 = vst.msk [vmem:[#allocation2] sm:$0xff] %vm19_vm0, %v92_v6 }
  0xcd   :  { %v88_v9 = vpop.f32.mrf.mxu0 }
  0xce   :  { %v93_v10 = vadd.f32 %v88_v9, %v23_v8 }
  0xcf   :  { %v145_v11 = vpop.f32.mrf.mxu0 }
  0xd0   :  { %96 = vst.msk [vmem:[#allocation2 + $0x8] sm:$0xff] %vm19_vm0, %v93_v10 }
  0xd3   :  { %v100_v13 = vld [vmem:[#allocation2] sm:$0xff] }
  0xd4   :  { %v109_v14 = vadd.f32 %v130_v12, %v100_v13 }
  0xd6   :  { %v133_v15 = vpack.c.bf16 %v109_v14, %v109_v14 }
  0xd7   :  { %v101_v16 = vld [vmem:[#allocation2 + $0x8] sm:$0xff] }
  0xd8   :  { %120 = vst.msk [vmem:[%s198_s3] sm:$0xf] %vm119_vm3, %v133_v15  ;;  %v110_v17 = vadd.f32 %v130_v12, %v101_v16 }
  0xda   :  { %v134_v18 = vpack.c.bf16 %v110_v17, %v110_v17 }
  0xdc   :  { %121 = vst.msk [vmem:[%s198_s3 + $0x4] sm:$0xf] %vm119_vm3, %v134_v18 }

// kernel: _lambda_.18
= control target key start
LH: loop header
LB: loop body
LE: loop exit
PB: predicated region body
PF: predicated region fallthrough
CT: control target
= control target key end

     0   :  { %s851_s15 = smov 0   ;;  %s853_s16 = smov 0   ;;  %s928_s0 = inlined_call_operand.vmem [shape: bf16[2,4,8,8], index: 0, kind: input, shape index: {}]   ;;  %s929_s1 = inlined_call_operand.vmem [shape: bf16[2,4,8,8], index: 1, kind: input, shape index: {}]   ;;  %s930_s2 = inlined_call_operand.vmem [shape: bf16[2,4,8,8], index: 2, kind: input, shape index: {}]   ;;  %s931_s3 = inlined_call_operand.vmem [shape: f32[2,1,8], index: 3, kind: input, shape index: {}]   ;;  %s932_s4 = inlined_call_operand.vmem [shape: bf16[2,4,8,8], index: 4, kind: output, shape index: {}]  }
   0x1   :  { %s855_s17 = smov 0   ;;  %s857_s18 = smov 0  }
   0x2   :  { %s859_s19 = smov 0  }
   0x3 LB: > { %s36_s20 = sadd.s32 1, %s812_s17  ;;  %s40_s21 = sadd.s32 1, %s816_s18  ;;  %s820_s19 = sphi %s859_s19, %s14_s19   ;;  %s816_s18 = sphi %s857_s18, %s936_s18   ;;  %s812_s17 = sphi %s855_s17, %s935_s17   ;;  %s808_s16 = sphi %s853_s16, %s934_s16   ;;  %s804_s15 = sphi %s851_s15, %s933_s15  }
   0x4   : > { %p38_p0 = scmp.ge.s32.totalorder %s36_s20, 4  ;;  %p701_p1 = scmp.ge.s32.totalorder %s820_s19, 1 }
   0x5   : > { %p255_p2 = scmp.lt.s32.totalorder %s820_s19, 9 }
   0x6   : > { %s938_s20 = smov (%p38_p0, %s36_s20), 0  ;;  %s940_s21 = smov (!%p38_p0, %s40_s21), %s816_s18 }
   0x7   : > { %p256_p3 = pnand %p701_p1, %p255_p2  ;;  %p42_p4 = scmp.ge.s32.totalorder %s940_s21, 2 }
   0x8   : > { %p321_p5 = scmp.lt.s32.totalorder (!%p256_p3), %s808_s16, 1  ;;  %p323_p6 = scmp.lt.s32.totalorder (!%p256_p3), %s804_s15, 3 }
   0x9   : > { %s942_s21 = smov (%p42_p4, %s940_s21), 0  ;;  %259 = sbr.rel (%p256_p3) target bundleno = 799 (0x31f), region = 36 }
   0xe   : > { %vm379_vm0 = vcmask 64512   ;;  %v822_v0 = vmov 0.0   ;;  %vm823_vm1 = vmmov 0   ;;  %s944_s16 = smov (!%p321_p5, %s808_s16), 1  ;;  %s946_s15 = smov (!%p323_p6, %s804_s15), 3  ;;  %v824_v4 = vmov 0  }
   0xf   : > { %718 = vmatprep.subr.bf16.mxu0 %v822_v0  ;;  %380 = vst.msk [vmem:[#allocation4] sm:$0xff] %vm379_vm0, %v822_v0  ;;  %720 = vmatprep.mubr.msk.bf16.mxu0 %vm823_vm1, %v822_v0  ;;  %s702_s22 = sshll.u32 %s944_s16, 2  ;;  %vm376_vm2 = vcmask 7168   ;;  %v825_v5 = vmov -inf   ;;  %s359_s7 = scalar_lea.vmem %s931_s3, %s944_s16  ;;  %v435_v6 = vlaneseq  ;;  %vm476_vm5 = vcmask 1043456  }
  0x10   : > { %724 = vmatprep.subr.bf16.mxu1 %v822_v0  ;;  %726 = vmatprep.mubr.msk.bf16.mxu1 %vm823_vm1, %v822_v0  ;;  %s329_s23 = sadd.s32 %s702_s22, %s946_s15  ;;  %377 = vst.msk [vmem:[#allocation2] sm:$0xff] %vm376_vm2, %v825_v5  ;;  %378 = vst.msk [vmem:[#allocation3] sm:$0xff] %vm376_vm2, %v822_v0  ;;  %v432_v7 = vld [vmem:[%s359_s7] sm:$0x1]  ;;  %vm536_vm6 = vcmask 60416  }
  0x11   : > { %s882_s24 = sshll.u32 %s329_s23, 2  ;;  %774 = vset.pattern.permute.xlu0 %v824_v4  ;;  %775 = vset.pattern.permute.xlu1 %v824_v4  ;;  %v436_v8 = vshrl.u32 %v435_v6, 7  ;;  %vm433_vm3 = vcmp.gt.f32.partialorder %v432_v7, 0.0 }
  0x12   : > { %s342_s27 = scalar_lea.vmem %s929_s1, %s882_s24  ;;  %s331_s30 = scalar_lea.vmem %s928_s0, %s882_s24  ;;  %v434_v10 = vsel %vm433_vm3, 1, %v824_v4 }
  0x13   : > { %v382_v1 = vld [vmem:[%s342_s27] sm:$0xf]  ;;  %v437_v9 = vsub.s32 0, %v436_v8  ;;  %s353_s10 = scalar_lea.vmem %s930_s2, %s882_s24  ;;  %s370_s13 = scalar_lea.vmem %s932_s4, %s882_s24 }
  0x14   : > { %v389_v2 = vsel %vm379_vm0, %v382_v1, 0  ;;  %v381_v3 = vld [vmem:[%s331_s30] sm:$0xf] }
  0x15   : > { %719 = vmatpush3.bf16.xpose.msra.mxu0 %v389_v2  ;;  %v438_v11 = vrot.slane %v434_v10, %v437_v9  ;;  %v383_v23 = vld [vmem:[%s353_s10] sm:$0xf] }
  0x16   : > { %v478_v24 = vsel %vm476_vm5, %v383_v23, 0  ;;  %v465_v39 = vld [vmem:[#allocation4] sm:$0xff] }
  0x17   : > { %vm439_vm4 = vcmp.eq.s32.totalorder %v438_v11, 1  ;;  %v441_v19 = vld [vmem:[#allocation2] sm:$0xff]  ;;  %725 = vmatpush3.bf16.msra.mxu1 %v478_v24  ;;  %v457_v33 = vld [vmem:[#allocation3] sm:$0xff] }
  0x1c   : > { %721 = vmatmul.mubr.msk.bf16.vlgmr.msra.gmra.mxu0 %vm379_vm0, %v381_v3 }
  0xdc   : > { %v425_v12 = vpop.f32.mrf.mxu0 }
  0xdd   : > { %v431_v13 = vmul.f32 0.35355338, %v425_v12 }
  0xde   : > { %v722_v14 = vpop.f32.mrf.mxu0 }
  0xdf   : > { %v440_v15 = vsel %vm439_vm4, %v431_v13, -1e+09 }
  0xe0   : > { %v428_v16 = vpop.f32.mrf.mxu0  ;;  %v442_v17 = vsel %vm379_vm0, %v440_v15, -inf }
  0xe1   : > { %443 = vmax.xlane.f32.xlu0 %v442_v17 }
  0xe2   : > { %v723_v18 = vpop.f32.mrf.mxu0 }
 0x16a   : > { %v444_v20 = vpop.xlane.xlu0 %443 }
 0x16b   : > { %v445_v21 = vmax.f32 %v441_v19, %v444_v20 }
 0x16d   : > { %v446_v22 = vsub.f32 %v441_v19, %v445_v21  ;;  %522 = vst.msk [vmem:[#allocation2] sm:$0xff] %vm376_vm2, %v445_v21  ;;  %451 = vperm.xlu0 %774, %v445_v21  }
 0x16f   : > { %v447_v29 = vmul.f32 1.442695, %v446_v22 }
 0x1e8   : > { %v452_v25 = vpop.permute.xlu0 %451 }
 0x1e9   : > { %v454_v26 = vsub.f32 %v440_v15, %v452_v25 }
 0x1eb   : > { %v455_v27 = vmul.f32 1.442695, %v454_v26 }
 0x1ed   : > { %776 = vpow2.f32 %v455_v27 }
 0x1ee   : > { %778 = vpow2.f32 %v447_v29 }
 0x1fa   : > { %v777_v28 = vpop.eup %776 }
 0x1fb   : > { %v459_v30 = vsel %vm379_vm0, %v777_v28, 0.0  ;;  %v472_v31 = vpack.c.bf16 %v777_v28, %v777_v28  ;;  %v779_v32 = vpop.eup %778 }
 0x1fc   : > { %460 = vadd.xlane.f32.xlu1 %v459_v30  ;;  %v458_v34 = vmul.f32 %v779_v32, %v457_v33 }
 0x1fd   : > { %727 = vmatmul.mubr.msk.bf16.vlgmr.msra.gmra.mxu1 %vm379_vm0, %v472_v31 }
 0x20d   : > { %468 = vperm.xlu1 %775, %v779_v32  }
 0x285   : > { %v461_v35 = vpop.xlane.xlu1 %460 }
 0x286   : > { %v462_v36 = vadd.f32 %v461_v35, %v458_v34 }
 0x288   : > { %464 = vst.msk [vmem:[#allocation3] sm:$0xff] %vm376_vm2, %v462_v36 }
 0x289   : > { %v469_v40 = vpop.permute.xlu1 %468 }
 0x28a   : > { %v471_v41 = vmul.f32 %v469_v40, %v465_v39 }
 0x28f   : > { %v526_v37 = vld [vmem:[#allocation3] sm:$0xff] }
 0x290   : > { %780 = vrcp.f32 %v526_v37 }
 0x29d   : > { %v781_v38 = vpop.eup %780 }
 0x29e   : > { %531 = vperm.xlu1 %775, %v781_v38  }
 0x2bd   : > { %v514_v42 = vpop.f32.mrf.mxu1 }
 0x2be   : > { %v520_v43 = vadd.f32 %v514_v42, %v471_v41 }
 0x2bf   : > { %v728_v44 = vpop.f32.mrf.mxu1 }
 0x2c0   : > { %521 = vst.msk [vmem:[#allocation4] sm:$0xff] %vm379_vm0, %v520_v43 }
 0x2c1   : > { %v517_v45 = vpop.f32.mrf.mxu1 }
 0x2c3   : > { %v729_v46 = vpop.f32.mrf.mxu1 }
 0x2c7   : > { %v528_v47 = vld [vmem:[#allocation4] sm:$0xff] }
 0x319   : > { %v532_v48 = vpop.permute.xlu1 %531 }
 0x31a   : > { %v534_v49 = vmul.f32 %v532_v48, %v528_v47 }
 0x31c   : > { %v535_v50 = vpack.c.bf16 %v534_v49, %v534_v49 }
 0x31e   : > { %537 = vst.msk [vmem:[%s370_s13] sm:$0xf] %vm536_vm6, %v535_v50 }
 0x31f PF: > { %s14_s19 = sadd.s32 1, %s820_s19   ;;  %s933_s15 = smov %s812_s17 }
 0x320   : > { %p11_p7 = scmp.ge.s32.totalorder %s14_s19, 10   ;;  %s934_s16 = smov %s816_s18 }
 0x321   : > { %s935_s17 = smov %s938_s20  ;;  %s936_s18 = smov %s942_s21 }
 0x322   :  { %13 = sbr.rel (!%p11_p7) target bundleno = 3 (0x3), region = 83 }

// kernel: _lambda_.19
= control target key start
LH: loop header
LB: loop body
LE: loop exit
PB: predicated region body
PF: predicated region fallthrough
CT: control target
= control target key end

     0   :  { %vm22_vm0 = vcmask 261120   ;;  %v163_v0 = vmov 0.0   ;;  %vm164_vm1 = vmmov 0   ;;  %vm127_vm2 = vcmask 257024   ;;  %s216_s1 = inlined_call_operand.vmem [shape: bf16[32,32], index: 1, kind: input, shape index: {}]   ;;  %s217_s0 = inlined_call_operand.vmem [shape: bf16[16,32], index: 0, kind: input, shape index: {}]   ;;  %s218_s3 = inlined_call_operand.vmem [shape: bf16[16,32], index: 3, kind: input, shape index: {}]   ;;  %s219_s2 = inlined_call_operand.vmem [shape: f32[1,32], index: 2, kind: input, shape index: {}]   ;;  %s220_s4 = inlined_call_operand.vmem [shape: bf16[16,32], index: 4, kind: output, shape index: {}]  }
   0x1   :  { %150 = vmatprep.subr.bf16.mxu0 %v163_v0  ;;  %v160_v1 = vld [vmem:[%s216_s1 + $0x8] sm:$0xff]   ;;  %154 = vmatprep.mubr.msk.bf16.mxu0 %vm164_vm1, %v163_v0  ;;  %23 = vst.msk [vmem:[#allocation2] sm:$0xff] %vm22_vm0, %v163_v0  ;;  %24 = vst.msk [vmem:[#allocation2 + $0x8] sm:$0xff] %vm22_vm0, %v163_v0  ;;  %v161_v2 = vld [vmem:[%s216_s1] sm:$0xff]  }
   0x2   :  { %151 = vmatpush3.bf16.msra.mxu0 %v160_v1  ;;  %v162_v3 = vld [vmem:[%s217_s0] sm:$0xff]  }
   0x3   :  { %152 = vmatprep.subr.bf16.mxu0 %v163_v0  ;;  %v144_v11 = vld [vmem:[%s218_s3] sm:$0xff]  }
   0x4   :  { %v138_v13 = vld [vmem:[%s219_s2] ss:$0 sm:$0xff]  ;;  %v145_v14 = vunpack.c.l.bf16 %v144_v11  ;;  %v146_v18 = vunpack.c.h.bf16 %v144_v11 }
   0x6   :  { %153 = vmatpush3.bf16.msra.mxu0 %v161_v2 }
   0x8   :  { %v25_v4 = vld [vmem:[#allocation2] sm:$0xff]  ;;  %v26_v8 = vld [vmem:[#allocation2 + $0x8] sm:$0xff] }
   0x9   :  { %155 = vmatmul.mubr.msk.bf16.vlgmr.msra.gmra.mxu0 %vm22_vm0, %v162_v3 }
  0xc9   :  { %v88_v5 = vpop.f32.mrf.mxu0 }
  0xca   :  { %v95_v6 = vadd.f32 %v88_v5, %v25_v4 }
  0xcb   :  { %v156_v7 = vpop.f32.mrf.mxu0 }
  0xcc   :  { %97 = vst.msk [vmem:[#allocation2] sm:$0xff] %vm22_vm0, %v95_v6 }
  0xcd   :  { %v91_v9 = vpop.f32.mrf.mxu0 }
  0xce   :  { %v96_v10 = vadd.f32 %v91_v9, %v26_v8 }
  0xcf   :  { %v157_v12 = vpop.f32.mrf.mxu0 }
  0xd0   :  { %98 = vst.msk [vmem:[#allocation2 + $0x8] sm:$0xff] %vm22_vm0, %v96_v10 }
  0xd3   :  { %v102_v15 = vld [vmem:[#allocation2] sm:$0xff] }
  0xd4   :  { %v111_v16 = vadd.f32 %v138_v13, %v102_v15 }
  0xd6   :  { %v117_v17 = vadd.f32 %v145_v14, %v111_v16 }
  0xd7   :  { %v103_v19 = vld [vmem:[#allocation2 + $0x8] sm:$0xff] }
  0xd8   :  { %v141_v20 = vpack.c.bf16 %v117_v17, %v117_v17  ;;  %v112_v21 = vadd.f32 %v138_v13, %v103_v19 }
  0xda   :  { %128 = vst.msk [vmem:[%s220_s4] sm:$0xf] %vm127_vm2, %v141_v20  ;;  %v118_v22 = vadd.f32 %v146_v18, %v112_v21 }
  0xdc   :  { %v142_v23 = vpack.c.bf16 %v118_v22, %v118_v22 }
  0xde   :  { %129 = vst.msk [vmem:[%s220_s4 + $0x4] sm:$0xf] %vm127_vm2, %v142_v23 }

// kernel: _lambda_.21
= control target key start
LH: loop header
LB: loop body
LE: loop exit
PB: predicated region body
PF: predicated region fallthrough
CT: control target
= control target key end

     0   :  { %vm19_vm0 = vcmask 523264   ;;  %v214_v0 = vmov 0.0   ;;  %vm215_vm1 = vmmov 0   ;;  %vm47_vm2 = vcmask 261120   ;;  %s259_s1 = inlined_call_operand.vmem [shape: bf16[32,64], index: 1, kind: input, shape index: {}]   ;;  %s260_s0 = inlined_call_operand.vmem [shape: bf16[16,32], index: 0, kind: input, shape index: {}]   ;;  %s261_s2 = inlined_call_operand.vmem [shape: f32[1,64], index: 2, kind: input, shape index: {}]   ;;  %s262_s3 = inlined_call_operand.vmem [shape: bf16[16,64], index: 3, kind: output, shape index: {}]  }
   0x1   :  { %192 = vmatprep.subr.bf16.mxu0 %v214_v0  ;;  %v203_v1 = vld [vmem:[%s259_s1 + $0x8] sm:$0xff]   ;;  %196 = vmatprep.mubr.msk.bf16.mxu0 %vm215_vm1, %v214_v0  ;;  %20 = vst.msk [vmem:[#allocation2] sm:$0xff] %vm19_vm0, %v214_v0  ;;  %21 = vst.msk [vmem:[#allocation2 + $0x8] sm:$0xff] %vm19_vm0, %v214_v0  ;;  %v204_v2 = vld [vmem:[%s259_s1] sm:$0xff]   ;;  %v216_v55 = vmov -1.0   ;;  %vm173_vm5 = vcmask 519168  }
   0x2   :  { %193 = vmatpush3.bf16.msra.mxu0 %v203_v1  ;;  %v205_v3 = vld [vmem:[%s260_s0] sm:$0xff]  }
   0x3   :  { %194 = vmatprep.subr.bf16.mxu0 %v214_v0  ;;  %v184_v12 = vld [vmem:[%s261_s2] ss:$0 sm:$0xff] }
   0x6   :  { %195 = vmatpush3.bf16.msra.mxu0 %v204_v2 }
   0x8   :  { %v22_v4 = vld [vmem:[#allocation2] sm:$0xff]  ;;  %v23_v8 = vld [vmem:[#allocation2 + $0x8] sm:$0xff] }
   0x9   :  { %197 = vmatmul.mubr.msk.bf16.vlgmr.msra.gmra.mxu0 %vm47_vm2, %v205_v3 }
  0xc9   :  { %v85_v5 = vpop.f32.mrf.mxu0 }
  0xca   :  { %v92_v6 = vadd.f32 %v85_v5, %v22_v4 }
  0xcb   :  { %v198_v7 = vpop.f32.mrf.mxu0 }
  0xcc   :  { %95 = vst.msk [vmem:[#allocation2] sm:$0xff] %vm19_vm0, %v92_v6 }
  0xcd   :  { %v88_v9 = vpop.f32.mrf.mxu0 }
  0xce   :  { %v93_v10 = vadd.f32 %v88_v9, %v23_v8 }
  0xcf   :  { %v199_v11 = vpop.f32.mrf.mxu0 }
  0xd0   :  { %96 = vst.msk [vmem:[#allocation2 + $0x8] sm:$0xff] %vm19_vm0, %v93_v10 }
  0xd3   :  { %v100_v13 = vld [vmem:[#allocation2] sm:$0xff] }
  0xd4   :  { %v109_v14 = vadd.f32 %v184_v12, %v100_v13 }
  0xd6   :  { %v113_v15 = vmul.f32 0.70710677, %v109_v14  ;;  %v111_v59 = vmul.f32 0.5, %v109_v14 }
  0xd7   :  { %v101_v16 = vld [vmem:[#allocation2 + $0x8] sm:$0xff] }
  0xd8   :  { %v119_v17 = vand.u32 2147483647, %v113_v15  ;;  %v110_v18 = vadd.f32 %v184_v12, %v101_v16  ;;  %vm115_vm3 = vcmp.ge.f32.partialorder %v113_v15, 0.0 }
  0xd9   :  { %v117_v56 = vsel %vm115_vm3, 1.0, %v216_v55 }
  0xda   :  { %v121_v19 = vmul.f32 0.3275911, %v119_v17  ;;  %v114_v20 = vmul.f32 0.70710677, %v110_v18  ;;  %v147_v25 = vsub.f32 0.0, %v119_v17  ;;  %v112_v2 = vmul.f32 0.5, %v110_v18 }
  0xdc   :  { %v123_v21 = vadd.f32 1.0, %v121_v19  ;;  %v120_v22 = vand.u32 2147483647, %v114_v20  ;;  %v149_v26 = vmul.f32 %v147_v25, %v119_v17  ;;  %vm116_vm4 = vcmp.ge.f32.partialorder %v114_v20, 0.0 }
  0xdd   :  { %v118_v62 = vsel %vm116_vm4, 1.0, %v216_v55 }
  0xde   :  { %206 = vrcp.f32 %v123_v21  ;;  %v122_v23 = vmul.f32 0.3275911, %v120_v22  ;;  %v148_v27 = vsub.f32 0.0, %v120_v22  ;;  %v151_v30 = vmul.f32 1.442695, %v149_v26 }
  0xe0   :  { %v124_v24 = vadd.f32 1.0, %v122_v23  ;;  %v150_v31 = vmul.f32 %v148_v27, %v120_v22 }
  0xe2   :  { %208 = vrcp.f32 %v124_v24  ;;  %v153_v36 = vmul.f32 1.442695, %v150_v31 }
  0xe3   :  { %210 = vpow2.f32 %v151_v30 }
  0xe4   :  { %212 = vpow2.f32 %v153_v36 }
  0xeb   :  { %v207_v28 = vpop.eup %206 }
  0xec   :  { %v129_v29 = vmul.f32 1.0614054, %v207_v28 }
  0xee   :  { %v131_v32 = vadd.f32 -1.4531521, %v129_v29 }
  0xef   :  { %v209_v33 = vpop.eup %208 }
  0xf0   :  { %v133_v34 = vmul.f32 %v207_v28, %v131_v32  ;;  %v130_v35 = vmul.f32 1.0614054, %v209_v33  ;;  %v211_v49 = vpop.eup %210 }
  0xf1   :  { %v213_v54 = vpop.eup %212 }
  0xf2   :  { %v135_v37 = vadd.f32 1.4214138, %v133_v34  ;;  %v132_v38 = vadd.f32 -1.4531521, %v130_v35 }
  0xf4   :  { %v137_v39 = vmul.f32 %v207_v28, %v135_v37  ;;  %v134_v40 = vmul.f32 %v209_v33, %v132_v38 }
  0xf6   :  { %v139_v41 = vadd.f32 -0.28449672, %v137_v39  ;;  %v136_v42 = vadd.f32 1.4214138, %v134_v40 }
  0xf8   :  { %v141_v43 = vmul.f32 %v207_v28, %v139_v41  ;;  %v138_v44 = vmul.f32 %v209_v33, %v136_v42 }
  0xfa   :  { %v143_v45 = vadd.f32 0.2548296, %v141_v43  ;;  %v140_v46 = vadd.f32 -0.28449672, %v138_v44 }
  0xfc   :  { %v145_v47 = vmul.f32 %v207_v28, %v143_v45  ;;  %v142_v48 = vmul.f32 %v209_v33, %v140_v46 }
  0xfe   :  { %v155_v50 = vmul.f32 %v211_v49, %v145_v47  ;;  %v144_v51 = vadd.f32 0.2548296, %v142_v48 }
 0x100   :  { %v157_v52 = vsub.f32 1.0, %v155_v50  ;;  %v146_v53 = vmul.f32 %v209_v33, %v144_v51 }
 0x102   :  { %v159_v57 = vmul.f32 %v157_v52, %v117_v56  ;;  %v156_v58 = vmul.f32 %v213_v54, %v146_v53 }
 0x104   :  { %v161_v60 = vadd.f32 1.0, %v159_v57  ;;  %v158_v61 = vsub.f32 1.0, %v156_v58 }
 0x106   :  { %v163_v63 = vmul.f32 %v161_v60, %v111_v59  ;;  %v160_v0 = vmul.f32 %v158_v61, %v118_v62 }
 0x108   :  { %v187_v1 = vpack.c.bf16 %v163_v63, %v163_v63  ;;  %v162_v3 = vadd.f32 1.0, %v160_v0 }
 0x10a   :  { %174 = vst.msk [vmem:[%s262_s3] sm:$0xf] %vm173_vm5, %v187_v1  ;;  %v164_v4 = vmul.f32 %v162_v3, %v112_v2 }
 0x10c   :  { %v188_v5 = vpack.c.bf16 %v164_v4, %v164_v4 }
 0x10e   :  { %175 = vst.msk [vmem:[%s262_s3 + $0x4] sm:$0xf] %vm173_vm5, %v188_v5 }

// kernel: _lambda_.22
= control target key start
LH: loop header
LB: loop body
LE: loop exit
PB: predicated region body
PF: predicated region fallthrough
CT: control target
= control target key end

     0   :  { %vm22_vm0 = vcmask 261120   ;;  %v190_v0 = vmov 0.0   ;;  %vm191_vm1 = vmmov 0   ;;  %vm66_vm2 = vcmask 523264   ;;  %s248_s1 = inlined_call_operand.vmem [shape: bf16[64,32], index: 1, kind: input, shape index: {}]   ;;  %s249_s0 = inlined_call_operand.vmem [shape: bf16[16,64], index: 0, kind: input, shape index: {}]   ;;  %s250_s3 = inlined_call_operand.vmem [shape: bf16[16,32], index: 3, kind: input, shape index: {}]   ;;  %s251_s2 = inlined_call_operand.vmem [shape: f32[1,32], index: 2, kind: input, shape index: {}]   ;;  %s252_s4 = inlined_call_operand.vmem [shape: bf16[16,32], index: 4, kind: output, shape index: {}]  }
   0x1   :  { %171 = vmatprep.subr.bf16.mxu0 %v190_v0  ;;  %v185_v1 = vld [vmem:[%s248_s1 + $0x18] sm:$0xff]   ;;  %179 = vmatprep.mubr.msk.bf16.mxu0 %vm191_vm1, %v190_v0  ;;  %23 = vst.msk [vmem:[#allocation2] sm:$0xff] %vm22_vm0, %v190_v0  ;;  %24 = vst.msk [vmem:[#allocation2 + $0x8] sm:$0xff] %vm22_vm0, %v190_v0  ;;  %v186_v2 = vld [vmem:[%s248_s1 + $0x10] sm:$0xff]   ;;  %vm144_vm3 = vcmask 257024  }
   0x2   :  { %172 = vmatpush3.bf16.msra.mxu0 %v185_v1  ;;  %v187_v3 = vld [vmem:[%s248_s1 + $0x8] sm:$0xff]   ;;  %v188_v4 = vld [vmem:[%s248_s1] sm:$0xff]  }
   0x3   :  { %173 = vmatprep.subr.bf16.mxu0 %v190_v0  ;;  %v189_v5 = vld [vmem:[%s249_s0] sm:$0xff]  }
   0x4   :  { %v163_v13 = vld [vmem:[%s250_s3] sm:$0xff]  }
   0x5   :  { %v157_v15 = vld [vmem:[%s251_s2] ss:$0 sm:$0xff]  ;;  %v164_v16 = vunpack.c.l.bf16 %v163_v13  ;;  %v165_v20 = vunpack.c.h.bf16 %v163_v13 }
   0x6   :  { %174 = vmatpush3.bf16.msra.mxu0 %v186_v2 }
   0x7   :  { %175 = vmatprep.subr.bf16.mxu0 %v190_v0 }
   0x8   :  { %v25_v6 = vld [vmem:[#allocation2] sm:$0xff]  ;;  %v26_v10 = vld [vmem:[#allocation2 + $0x8] sm:$0xff] }
   0xa   :  { %176 = vmatpush3.bf16.msra.mxu0 %v187_v3 }
   0xb   :  { %177 = vmatprep.subr.bf16.mxu0 %v190_v0 }
   0xe   :  { %178 = vmatpush3.bf16.msra.mxu0 %v188_v4 }
  0x11   :  { %180 = vmatmul.mubr.msk.bf16.vlgmr.msra.gmra.mxu0 %vm66_vm2, %v189_v5 }
  0xd1   :  { %v104_v7 = vpop.f32.mrf.mxu0 }
  0xd2   :  { %v111_v8 = vadd.f32 %v104_v7, %v25_v6 }
  0xd3   :  { %v181_v9 = vpop.f32.mrf.mxu0 }
  0xd4   :  { %114 = vst.msk [vmem:[#allocation2] sm:$0xff] %vm22_vm0, %v111_v8 }
  0xd5   :  { %v107_v11 = vpop.f32.mrf.mxu0 }
  0xd6   :  { %v112_v12 = vadd.f32 %v107_v11, %v26_v10 }
  0xd7   :  { %v182_v14 = vpop.f32.mrf.mxu0 }
  0xd8   :  { %115 = vst.msk [vmem:[#allocation2 + $0x8] sm:$0xff] %vm22_vm0, %v112_v12 }
  0xdb   :  { %v119_v17 = vld [vmem:[#allocation2] sm:$0xff] }
  0xdc   :  { %v128_v18 = vadd.f32 %v157_v15, %v119_v17 }
  0xde   :  { %v134_v19 = vadd.f32 %v164_v16, %v128_v18 }
  0xdf   :  { %v120_v21 = vld [vmem:[#allocation2 + $0x8] sm:$0xff] }
  0xe0   :  { %v160_v22 = vpack.c.bf16 %v134_v19, %v134_v19  ;;  %v129_v23 = vadd.f32 %v157_v15, %v120_v21 }
  0xe2   :  { %145 = vst.msk [vmem:[%s252_s4] sm:$0xf] %vm144_vm3, %v160_v22  ;;  %v135_v24 = vadd.f32 %v165_v20, %v129_v23 }
  0xe4   :  { %v161_v25 = vpack.c.bf16 %v135_v24, %v135_v24 }
  0xe6   :  { %146 = vst.msk [vmem:[%s252_s4 + $0x4] sm:$0xf] %vm144_vm3, %v161_v25 }

</bundles_post_ra>
